<compile_context>
chip_gen: v6e
topology: v6e:2x2x1
jax: 0.10.0
libtpu: 0.0.40
codegen_flags: <defaults>
</compile_context>

<pallas_src>
import math
from functools import partial

import jax
import jax.numpy as jnp
from jax.experimental import pallas as pl
from jax.experimental.pallas import tpu as pltpu

_EPS = 1e-5  # PyTorch nn.LayerNorm default eps


# ----------------------------------------------------------------------------
# In-kernel helpers
# ----------------------------------------------------------------------------
def _normalize(x):
    """LayerNorm statistics only (the affine is folded into downstream weights)."""
    mu = jnp.mean(x, axis=-1, keepdims=True)
    var = jnp.mean(jnp.square(x - mu), axis=-1, keepdims=True)
    return (x - mu) * jax.lax.rsqrt(var + _EPS)


def _mha_core(hq, hk, hv, num_heads, head_dim):
    """Per-head softmax attention on concat-head activations.

    hq: (QL, H), already scaled by 1/sqrt(head_dim); hk, hv: (KL, H).
    Returns the concat-head context (QL, H).  At these sizes (L=8, hd=8) the
    per-head matmuls issue the same MXU work as a batched einsum would while
    avoiding in-kernel (L, H) -> (nh, L, hd) relayouts.
    """
    ctxs = []
    for n in range(num_heads):
        lo, hi = n * head_dim, (n + 1) * head_dim
        qh, kh, vh = hq[:, lo:hi], hk[:, lo:hi], hv[:, lo:hi]
        # scores = q @ k^T (contract the last dim of both operands; no transpose op)
        s = jax.lax.dot_general(qh, kh, (((1,), (1,)), ((), ())),
                                preferred_element_type=jnp.float32)
        s = s - jnp.max(s, axis=-1, keepdims=True)
        e = jnp.exp(s)
        p = e / jnp.sum(e, axis=-1, keepdims=True)   # exact softmax (no approx recip)
        ctxs.append(jnp.dot(p, vh, preferred_element_type=jnp.float32))
    return jnp.concatenate(ctxs, axis=-1)


def _gated_out(qn, ctx, wo, wg, bg):
    """o_net + sigmoid gate mix of GatedMultiHeadAttn."""
    attn_out = jnp.dot(ctx, wo, preferred_element_type=jnp.float32)
    gate_in = jnp.concatenate([qn, attn_out], axis=-1)           # (QL, 2*Dq)
    gate = jax.nn.sigmoid(
        jnp.dot(gate_in, wg, preferred_element_type=jnp.float32) + bg)
    return gate * qn + (1.0 - gate) * attn_out


# ----------------------------------------------------------------------------
# Fused kernel: p_layer, g_layer, p_attn, g_attn -> one packed output
# ----------------------------------------------------------------------------
def _fused_kernel(pattern_ref, graph_ref, w_ghat_ref, w_phat_ref, w_misc_ref,
                  vec_ref, q_aff_ref, out_ref, *,
                  batch, num_heads, hidden, dp, dg):
    H, nh = hidden, num_heads
    hd = H // nh

    w_ghat = w_ghat_ref[...]          # (dg, 4H): [paQ' | gaQ' | gaK' | gaV']
    w_phat = w_phat_ref[...]          # (dp, 2H): [paK' | paV']
    w_misc = w_misc_ref[...]          # row-stacked 32-lane weights
    vecs = vec_ref[...]               # (3, 4H) packed bias rows
    q_aff = q_aff_ref[...]            # (4, dg): [gamma_q^pa; beta_q^pa; gamma_q^ga; beta_q^ga]

    # Static row slices of the packed weight slab (zero-cost at trace time).
    o = 0
    p_layer_w = w_misc[o:o + dp]; o += dp
    g_layer_w = w_misc[o:o + dg]; o += dg
    wo_pa = w_misc[o:o + H]; o += H
    wo_ga = w_misc[o:o + H]; o += H
    wg_pa = w_misc[o:o + 2 * dg]; o += 2 * dg
    wg_ga = w_misc[o:o + 2 * dg]; o += 2 * dg

    b_ghat = vecs[0:1, 0:4 * H]
    b_phat = vecs[1:2, 0:2 * H]
    p_layer_b = vecs[2:3, 0:H]
    g_layer_b = vecs[2:3, H:2 * H]
    bg_pa = vecs[2:3, 2 * H:2 * H + dg]
    bg_ga = vecs[2:3, 2 * H + dg:2 * H + 2 * dg]

    pat = pattern_ref[...]            # (B, PLEN, dp)
    gra = graph_ref[...]              # (B, GLEN, dg)

    for b in range(batch):            # static unroll; batch is tiny
        p_b = pat[b]
        g_b = gra[b]

        # p_layer / g_layer (raw inputs)
        p_proj = jnp.dot(p_b, p_layer_w,
                         preferred_element_type=jnp.float32) + p_layer_b
        g_proj = jnp.dot(g_b, g_layer_w,
                         preferred_element_type=jnp.float32) + g_layer_b

        # One mean/var normalization per distinct input; the LN affines are
        # folded into the stacked projection weights host-side.
        g_hat = _normalize(g_b)
        p_hat = _normalize(p_b)

        # Stacked QKV projections: one 4H-wide matmul from normalized graph
        # (p_attn Q + g_attn Q/K/V) and one 2H-wide from normalized pattern
        # (p_attn K/V).
        g_heads = jnp.dot(g_hat, w_ghat,
                          preferred_element_type=jnp.float32) + b_ghat
        p_heads = jnp.dot(p_hat, w_phat,
                          preferred_element_type=jnp.float32) + b_phat

        # p_attn: query = graph, key = value = pattern
        qn_pa = g_hat * q_aff[0:1] + q_aff[1:2]
        ctx_pa = _mha_core(g_heads[:, 0:H], p_heads[:, 0:H],
                           p_heads[:, H:2 * H], nh, hd)
        out_pa = _gated_out(qn_pa, ctx_pa, wo_pa, wg_pa, bg_pa)

        # g_attn: query = key = value = graph
        qn_ga = g_hat * q_aff[2:3] + q_aff[3:4]
        ctx_ga = _mha_core(g_heads[:, H:2 * H], g_heads[:, 2 * H:3 * H],
                           g_heads[:, 3 * H:4 * H], nh, hd)
        out_ga = _gated_out(qn_ga, ctx_ga, wo_ga, wg_ga, bg_ga)

        # Single lane-dense packed store: (L, 2*hidden + 2*dg) = 128 lanes here.
        out_ref[b] = jnp.concatenate([p_proj, g_proj, out_pa, out_ga], axis=-1)


# ----------------------------------------------------------------------------
# Host-side parameter packing (LN-affine folding + weight slabs)
# ----------------------------------------------------------------------------
def _fold_ln_into_weight(ln_g, ln_b, w, scale=1.0):
    """(x_hat * g + b) @ (w * scale) == x_hat @ w_f + b_f."""
    w_f = (ln_g.reshape(-1, 1) * w) * scale
    b_f = (ln_b @ w) * scale
    return w_f, b_f


def _pack_params(params):
    pa, ga = params["p_attn"], params["g_attn"]
    hidden = params["p_layer_w"].shape[1]
    dp = params["p_layer_w"].shape[0]
    dg = params["g_layer_w"].shape[0]
    nh = pa["num_heads"]
    hd = hidden // nh
    scale = 1.0 / math.sqrt(hd)

    paq_w, paq_b = _fold_ln_into_weight(pa["q_ln_g"], pa["q_ln_b"], pa["wq"], scale)
    gaq_w, gaq_b = _fold_ln_into_weight(ga["q_ln_g"], ga["q_ln_b"], ga["wq"], scale)
    gak_w, gak_b = _fold_ln_into_weight(ga["k_ln_g"], ga["k_ln_b"], ga["wk"])
    gav_w, gav_b = _fold_ln_into_weight(ga["v_ln_g"], ga["v_ln_b"], ga["wv"])
    pak_w, pak_b = _fold_ln_into_weight(pa["k_ln_g"], pa["k_ln_b"], pa["wk"])
    pav_w, pav_b = _fold_ln_into_weight(pa["v_ln_g"], pa["v_ln_b"], pa["wv"])

    w_ghat = jnp.concatenate([paq_w, gaq_w, gak_w, gav_w], axis=1)   # (dg, 4H)
    b_ghat = jnp.concatenate([paq_b, gaq_b, gak_b, gav_b], axis=1)   # (1, 4H)
    w_phat = jnp.concatenate([pak_w, pav_w], axis=1)                 # (dp, 2H)
    b_phat = jnp.concatenate([pak_b, pav_b], axis=1)                 # (1, 2H)

    # Row-stacked 32-lane weight slab (single DMA, sliced statically in-kernel).
    w_misc = jnp.concatenate([params["p_layer_w"], params["g_layer_w"],
                              pa["wo"], ga["wo"], pa["wg"], ga["wg"]], axis=0)

    width = 4 * hidden
    assert 2 * hidden + 2 * dg <= width
    row0 = b_ghat
    row1 = jnp.pad(b_phat, ((0, 0), (0, width - 2 * hidden)))
    row2 = jnp.concatenate([params["p_layer_b"], params["g_layer_b"],
                            pa["bg"], ga["bg"]], axis=1)
    row2 = jnp.pad(row2, ((0, 0), (0, width - row2.shape[1])))
    vec_misc = jnp.concatenate([row0, row1, row2], axis=0)           # (3, 4H)

    q_aff = jnp.concatenate([pa["q_ln_g"], pa["q_ln_b"],
                             ga["q_ln_g"], ga["q_ln_b"]], axis=0)    # (4, dg)
    return w_ghat, w_phat, w_misc, vec_misc, q_aff


# ----------------------------------------------------------------------------
# Wrapper (single grid-less pallas_call, packed lane-dense output)
# ----------------------------------------------------------------------------
def base_attn_predictnet_components(pattern, graph, params):
    """Runs every parametric op defined by BaseAttnPredictNet.__init__ in one
    fused pallas_call and returns the four sub-module outputs."""
    # TODO(synk): BaseAttnPredictNet.forward is abstract (NotImplementedError);
    # the aggregation into a final prediction is only defined in subclasses.
    B, PLEN, dp = pattern.shape
    _, GLEN, dg = graph.shape
    hidden = params["p_layer_w"].shape[1]
    nh = params["p_attn"]["num_heads"]
    hd = hidden // nh
    assert PLEN == GLEN, "packed output layout assumes PLEN == GLEN"
    assert dg == hidden, "packed weight slab assumes graph_dim == hidden_dim"
    # TODO(synk): generalize packing for PLEN != GLEN / graph_dim != hidden_dim.

    w_ghat, w_phat, w_misc, vec_misc, q_aff = _pack_params(params)
    args = (pattern, graph, w_ghat, w_phat, w_misc, vec_misc, q_aff)

    out_width = 2 * hidden + 2 * dg
    flops = 2 * B * (
        PLEN * dp * hidden + GLEN * dg * hidden
        + GLEN * dg * 4 * hidden + PLEN * dp * 2 * hidden
        + 2 * nh * GLEN * PLEN * hd + 2 * nh * GLEN * GLEN * hd
        + 2 * GLEN * hidden * dg + 2 * GLEN * 2 * dg * dg)
    transcendentals = B * (nh * GLEN * (PLEN + GLEN) + 2 * GLEN * dg + PLEN + GLEN)
    bytes_accessed = 4 * (sum(int(a.size) for a in args) + B * GLEN * out_width)

    vmem = pl.BlockSpec(memory_space=pltpu.MemorySpace.VMEM)
    packed = pl.pallas_call(
        partial(_fused_kernel, batch=B, num_heads=nh, hidden=hidden, dp=dp, dg=dg),
        out_shape=jax.ShapeDtypeStruct((B, GLEN, out_width), jnp.float32),
        in_specs=[vmem] * len(args),
        out_specs=vmem,
        cost_estimate=pl.CostEstimate(flops=flops,
                                      transcendentals=transcendentals,
                                      bytes_accessed=bytes_accessed),
    )(*args)

    return {
        "p_proj": packed[:, :, 0:hidden],
        "g_proj": packed[:, :, hidden:2 * hidden],
        "p_attn": packed[:, :, 2 * hidden:2 * hidden + dg],
        "g_attn": packed[:, :, 2 * hidden + dg:2 * hidden + 2 * dg],
    }


# ----------------------------------------------------------------------------
# Deterministic parameter initialization (matches the module's __init__)
# ----------------------------------------------------------------------------
def init_gmha(key, query_dim, key_dim, value_dim, hidden_dim, num_heads):
    head_dim = hidden_dim // num_heads
    scale = 1.0 / math.sqrt(head_dim)
    ks = jax.random.split(key, 5)
    p = {"num_heads": num_heads}
    p["wq"] = scale * jax.random.normal(ks[0], (query_dim, hidden_dim), jnp.float32)
    p["wk"] = scale * jax.random.normal(ks[1], (key_dim, hidden_dim), jnp.float32)
    p["wv"] = scale * jax.random.normal(ks[2], (value_dim, hidden_dim), jnp.float32)
    p["wo"] = scale * jax.random.normal(ks[3], (hidden_dim, query_dim), jnp.float32)
    p["wg"] = scale * jax.random.normal(ks[4], (2 * query_dim, query_dim), jnp.float32)
    p["bg"] = jnp.ones((1, query_dim), jnp.float32)          # g_net bias init = ones
    for nm, d in (("q", query_dim), ("k", key_dim), ("v", value_dim)):
        p[f"{nm}_ln_g"] = jnp.ones((1, d), jnp.float32)      # pre_lnorm LayerNorms
        p[f"{nm}_ln_b"] = jnp.zeros((1, d), jnp.float32)
    return p


def init_base_attn_predictnet(key, pattern_dim, graph_dim, hidden_dim, num_heads):
    ks = jax.random.split(key, 5)
    s = 1.0 / math.sqrt(hidden_dim)
    return {
        "p_layer_w": s * jax.random.normal(ks[0], (pattern_dim, hidden_dim), jnp.float32),
        "p_layer_b": jnp.zeros((1, hidden_dim), jnp.float32),
        "g_layer_w": s * jax.random.normal(ks[1], (graph_dim, hidden_dim), jnp.float32),
        "g_layer_b": jnp.zeros((1, hidden_dim), jnp.float32),
        "p_attn": init_gmha(ks[2], graph_dim, pattern_dim, pattern_dim, hidden_dim, num_heads),
        "g_attn": init_gmha(ks[3], graph_dim, graph_dim, graph_dim, hidden_dim, num_heads),
        # pred_layer1 / pred_layer2 are only consumed by subclass forwards.
        "pred1_w": s * jax.random.normal(ks[4], (hidden_dim * 4 + 4, hidden_dim), jnp.float32),
        "pred1_b": jnp.zeros((1, hidden_dim), jnp.float32),
        "pred2_w": jnp.zeros((hidden_dim + 4, 1), jnp.float32),
        "pred2_b": jnp.zeros((1, 1), jnp.float32),
    }


# ----------------------------------------------------------------------------
# Pure-JAX reference (full-precision matmuls) for the correctness check
# ----------------------------------------------------------------------------
_HIGH = jax.lax.Precision.HIGHEST


def _ln_ref(x, g, b):
    mu = x.mean(-1, keepdims=True)
    var = ((x - mu) ** 2).mean(-1, keepdims=True)
    return (x - mu) / jnp.sqrt(var + _EPS) * g[0] + b[0]


def gmha_ref(query, key_, value, p):
    nh = p["num_heads"]
    H = p["wq"].shape[1]
    hd = H // nh
    qn = _ln_ref(query, p["q_ln_g"], p["q_ln_b"])
    kn = _ln_ref(key_, p["k_ln_g"], p["k_ln_b"])
    vn = _ln_ref(value, p["v_ln_g"], p["v_ln_b"])
    B, QL, _ = query.shape
    KL = key_.shape[1]
    hq = jnp.matmul(qn, p["wq"], precision=_HIGH).reshape(B, QL, nh, hd)
    hk = jnp.matmul(kn, p["wk"], precision=_HIGH).reshape(B, KL, nh, hd)
    hv = jnp.matmul(vn, p["wv"], precision=_HIGH).reshape(B, KL, nh, hd)
    s = jnp.einsum("bind,bjnd->bijn", hq, hk, precision=_HIGH) / math.sqrt(hd)
    a = jax.nn.softmax(s, axis=2)                      # softmax over the key axis
    av = jnp.einsum("bijn,bjnd->bind", a, hv, precision=_HIGH).reshape(B, QL, H)
    ao = jnp.matmul(av, p["wo"], precision=_HIGH)
    gate = jax.nn.sigmoid(
        jnp.matmul(jnp.concatenate([qn, ao], axis=-1), p["wg"], precision=_HIGH)
        + p["bg"][0])
    return gate * qn + (1.0 - gate) * ao


def linear_ref(x, w, b):
    return jnp.matmul(x, w, precision=_HIGH) + b[0]


# ----------------------------------------------------------------------------
if __name__ == "__main__":
    pattern_dim, graph_dim, hidden_dim, num_heads = 32, 32, 32, 4
    B, PLEN, GLEN = 2, 8, 8

    root = jax.random.PRNGKey(0)
    k_par, k_pat, k_gra = jax.random.split(root, 3)

    params = init_base_attn_predictnet(k_par, pattern_dim, graph_dim,
                                       hidden_dim, num_heads)

    # Perturb LN affine / bias params away from their (ones/zeros) init so the
    # host-side LN-affine folding and bias packing are genuinely exercised.
    pk = jax.random.split(jax.random.PRNGKey(1), 16)
    i = 0
    for mod in ("p_attn", "g_attn"):
        for nm in ("q", "k", "v"):
            d = params[mod][f"{nm}_ln_g"].shape[1]
            params[mod][f"{nm}_ln_g"] = 1.0 + 0.1 * jax.random.normal(pk[i], (1, d)); i += 1
            params[mod][f"{nm}_ln_b"] = 0.1 * jax.random.normal(pk[i], (1, d)); i += 1
        dq = params[mod]["bg"].shape[1]
        params[mod]["bg"] = 1.0 + 0.1 * jax.random.normal(pk[i], (1, dq)); i += 1
    params["p_layer_b"] = 0.1 * jax.random.normal(pk[i], (1, hidden_dim)); i += 1
    params["g_layer_b"] = 0.1 * jax.random.normal(pk[i], (1, hidden_dim)); i += 1

    pattern = jax.random.normal(k_pat, (B, PLEN, pattern_dim), jnp.float32)
    graph = jax.random.normal(k_gra, (B, GLEN, graph_dim), jnp.float32)

    outs = base_attn_predictnet_components(pattern, graph, params)
    jax.block_until_ready(outs)

    ref = {
        "p_proj": linear_ref(pattern, params["p_layer_w"], params["p_layer_b"]),
        "g_proj": linear_ref(graph, params["g_layer_w"], params["g_layer_b"]),
        "p_attn": gmha_ref(graph, pattern, pattern, params["p_attn"]),
        "g_attn": gmha_ref(graph, graph, graph, params["g_attn"]),
    }
    # Tolerance sized for TPU MXU f32 matmul-pass behaviour (reference is
    # computed at Precision.HIGHEST); the kernel uses exact softmax division.
    for name in ("p_proj", "g_proj", "p_attn", "g_attn"):
        assert bool(jnp.allclose(outs[name], ref[name], atol=2e-2, rtol=2e-2)), name

    print("KERNEL_OK")
</pallas_src>

<mosaic_0001>
module attributes {stable_mosaic.version = 11 : i64} {
  func.func @_fused_kernel(%arg0: memref<2x8x32xf32, #tpu.memory_space<vmem>>, %arg1: memref<2x8x32xf32, #tpu.memory_space<vmem>>, %arg2: memref<32x128xf32, #tpu.memory_space<vmem>>, %arg3: memref<32x64xf32, #tpu.memory_space<vmem>>, %arg4: memref<256x32xf32, #tpu.memory_space<vmem>>, %arg5: memref<3x128xf32, #tpu.memory_space<vmem>>, %arg6: memref<4x32xf32, #tpu.memory_space<vmem>>, %arg7: memref<2x8x128xf32, #tpu.memory_space<vmem>>) attributes {dimension_semantics = [], scalar_prefetch = 0 : i64, scratch_operands = 0 : i64, tpu.core_type = #tpu.core_type<tc>} {
    %c0 = arith.constant 0 : index
    %c0_0 = arith.constant 0 : index
    %0 = vector.load %arg2[%c0, %c0_0] : memref<32x128xf32, #tpu.memory_space<vmem>>, vector<32x128xf32>
    %c0_1 = arith.constant 0 : index
    %c0_2 = arith.constant 0 : index
    %1 = vector.load %arg3[%c0_1, %c0_2] : memref<32x64xf32, #tpu.memory_space<vmem>>, vector<32x64xf32>
    %c0_3 = arith.constant 0 : index
    %c0_4 = arith.constant 0 : index
    %2 = vector.load %arg4[%c0_3, %c0_4] : memref<256x32xf32, #tpu.memory_space<vmem>>, vector<256x32xf32>
    %c0_5 = arith.constant 0 : index
    %c0_6 = arith.constant 0 : index
    %3 = vector.load %arg5[%c0_5, %c0_6] : memref<3x128xf32, #tpu.memory_space<vmem>>, vector<3x128xf32>
    %c0_7 = arith.constant 0 : index
    %c0_8 = arith.constant 0 : index
    %4 = vector.load %arg6[%c0_7, %c0_8] : memref<4x32xf32, #tpu.memory_space<vmem>>, vector<4x32xf32>
    %5 = vector.extract_strided_slice %2 {offsets = [0, 0], sizes = [32, 32], strides = [1, 1]} : vector<256x32xf32> to vector<32x32xf32>
    %6 = vector.extract_strided_slice %2 {offsets = [32, 0], sizes = [32, 32], strides = [1, 1]} : vector<256x32xf32> to vector<32x32xf32>
    %7 = vector.extract_strided_slice %2 {offsets = [64, 0], sizes = [32, 32], strides = [1, 1]} : vector<256x32xf32> to vector<32x32xf32>
    %8 = vector.extract_strided_slice %2 {offsets = [96, 0], sizes = [32, 32], strides = [1, 1]} : vector<256x32xf32> to vector<32x32xf32>
    %9 = vector.extract_strided_slice %2 {offsets = [128, 0], sizes = [64, 32], strides = [1, 1]} : vector<256x32xf32> to vector<64x32xf32>
    %10 = vector.extract_strided_slice %2 {offsets = [192, 0], sizes = [64, 32], strides = [1, 1]} : vector<256x32xf32> to vector<64x32xf32>
    %11 = vector.extract_strided_slice %3 {offsets = [0, 0], sizes = [1, 128], strides = [1, 1]} : vector<3x128xf32> to vector<1x128xf32>
    %12 = vector.extract_strided_slice %3 {offsets = [1, 0], sizes = [1, 64], strides = [1, 1]} : vector<3x128xf32> to vector<1x64xf32>
    %13 = vector.extract_strided_slice %3 {offsets = [2, 0], sizes = [1, 32], strides = [1, 1]} : vector<3x128xf32> to vector<1x32xf32>
    %14 = vector.extract_strided_slice %3 {offsets = [2, 32], sizes = [1, 32], strides = [1, 1]} : vector<3x128xf32> to vector<1x32xf32>
    %15 = vector.extract_strided_slice %3 {offsets = [2, 64], sizes = [1, 32], strides = [1, 1]} : vector<3x128xf32> to vector<1x32xf32>
    %16 = vector.extract_strided_slice %3 {offsets = [2, 96], sizes = [1, 32], strides = [1, 1]} : vector<3x128xf32> to vector<1x32xf32>
    %c0_9 = arith.constant 0 : index
    %c0_10 = arith.constant 0 : index
    %c0_11 = arith.constant 0 : index
    %17 = vector.load %arg0[%c0_9, %c0_10, %c0_11] : memref<2x8x32xf32, #tpu.memory_space<vmem>>, vector<2x8x32xf32>
    %c0_12 = arith.constant 0 : index
    %c0_13 = arith.constant 0 : index
    %c0_14 = arith.constant 0 : index
    %18 = vector.load %arg1[%c0_12, %c0_13, %c0_14] : memref<2x8x32xf32, #tpu.memory_space<vmem>>, vector<2x8x32xf32>
    %19 = vector.extract_strided_slice %17 {offsets = [0, 0, 0], sizes = [1, 8, 32], strides = [1, 1, 1]} : vector<2x8x32xf32> to vector<1x8x32xf32>
    %20 = vector.shape_cast %19 : vector<1x8x32xf32> to vector<8x32xf32>
    %21 = vector.extract_strided_slice %18 {offsets = [0, 0, 0], sizes = [1, 8, 32], strides = [1, 1, 1]} : vector<2x8x32xf32> to vector<1x8x32xf32>
    %22 = vector.shape_cast %21 : vector<1x8x32xf32> to vector<8x32xf32>
    %cst = arith.constant dense<0.000000e+00> : vector<8x32xf32>
    %23 = tpu.matmul %20, %5, %cst {dimension_numbers = #tpu.dot_dimension_numbers<[1], [0], [0], [1], [0, 0, 1, 1], [], []>} : vector<8x32xf32>, vector<32x32xf32>, vector<8x32xf32> -> vector<8x32xf32>
    %24 = vector.broadcast %13 : vector<1x32xf32> to vector<8x32xf32>
    %25 = arith.addf %23, %24 : vector<8x32xf32>
    %cst_15 = arith.constant dense<0.000000e+00> : vector<8x32xf32>
    %26 = tpu.matmul %22, %6, %cst_15 {dimension_numbers = #tpu.dot_dimension_numbers<[1], [0], [0], [1], [0, 0, 1, 1], [], []>} : vector<8x32xf32>, vector<32x32xf32>, vector<8x32xf32> -> vector<8x32xf32>
    %27 = vector.broadcast %14 : vector<1x32xf32> to vector<8x32xf32>
    %28 = arith.addf %26, %27 : vector<8x32xf32>
    %cst_16 = arith.constant dense<0.000000e+00> : vector<8xf32>
    %29 = vector.multi_reduction <add>, %22, %cst_16 [1] : vector<8x32xf32> to vector<8xf32>
    %30 = vector.shape_cast %29 : vector<8xf32> to vector<8x1xf32>
    %cst_17 = arith.constant 3.200000e+01 : f32
    %31 = vector.broadcast %cst_17 : f32 to vector<8x1xf32>
    %32 = arith.divf %30, %31 : vector<8x1xf32>
    %33 = vector.broadcast %32 : vector<8x1xf32> to vector<8x32xf32>
    %34 = arith.subf %22, %33 : vector<8x32xf32>
    %35 = arith.mulf %34, %34 : vector<8x32xf32>
    %cst_18 = arith.constant dense<0.000000e+00> : vector<8xf32>
    %36 = vector.multi_reduction <add>, %35, %cst_18 [1] : vector<8x32xf32> to vector<8xf32>
    %37 = vector.shape_cast %36 : vector<8xf32> to vector<8x1xf32>
    %cst_19 = arith.constant 3.200000e+01 : f32
    %38 = vector.broadcast %cst_19 : f32 to vector<8x1xf32>
    %39 = arith.divf %37, %38 : vector<8x1xf32>
    %40 = vector.broadcast %32 : vector<8x1xf32> to vector<8x32xf32>
    %41 = arith.subf %22, %40 : vector<8x32xf32>
    %cst_20 = arith.constant 9.99999974E-6 : f32
    %42 = vector.broadcast %cst_20 : f32 to vector<8x1xf32>
    %43 = arith.addf %39, %42 : vector<8x1xf32>
    %44 = math.rsqrt %43 : vector<8x1xf32>
    %45 = vector.broadcast %44 : vector<8x1xf32> to vector<8x32xf32>
    %46 = arith.mulf %41, %45 : vector<8x32xf32>
    %cst_21 = arith.constant dense<0.000000e+00> : vector<8xf32>
    %47 = vector.multi_reduction <add>, %20, %cst_21 [1] : vector<8x32xf32> to vector<8xf32>
    %48 = vector.shape_cast %47 : vector<8xf32> to vector<8x1xf32>
    %cst_22 = arith.constant 3.200000e+01 : f32
    %49 = vector.broadcast %cst_22 : f32 to vector<8x1xf32>
    %50 = arith.divf %48, %49 : vector<8x1xf32>
    %51 = vector.broadcast %50 : vector<8x1xf32> to vector<8x32xf32>
    %52 = arith.subf %20, %51 : vector<8x32xf32>
    %53 = arith.mulf %52, %52 : vector<8x32xf32>
    %cst_23 = arith.constant dense<0.000000e+00> : vector<8xf32>
    %54 = vector.multi_reduction <add>, %53, %cst_23 [1] : vector<8x32xf32> to vector<8xf32>
    %55 = vector.shape_cast %54 : vector<8xf32> to vector<8x1xf32>
    %cst_24 = arith.constant 3.200000e+01 : f32
    %56 = vector.broadcast %cst_24 : f32 to vector<8x1xf32>
    %57 = arith.divf %55, %56 : vector<8x1xf32>
    %58 = vector.broadcast %50 : vector<8x1xf32> to vector<8x32xf32>
    %59 = arith.subf %20, %58 : vector<8x32xf32>
    %cst_25 = arith.constant 9.99999974E-6 : f32
    %60 = vector.broadcast %cst_25 : f32 to vector<8x1xf32>
    %61 = arith.addf %57, %60 : vector<8x1xf32>
    %62 = math.rsqrt %61 : vector<8x1xf32>
    %63 = vector.broadcast %62 : vector<8x1xf32> to vector<8x32xf32>
    %64 = arith.mulf %59, %63 : vector<8x32xf32>
    %cst_26 = arith.constant dense<0.000000e+00> : vector<8x128xf32>
    %65 = tpu.matmul %46, %0, %cst_26 {dimension_numbers = #tpu.dot_dimension_numbers<[1], [0], [0], [1], [0, 0, 1, 1], [], []>} : vector<8x32xf32>, vector<32x128xf32>, vector<8x128xf32> -> vector<8x128xf32>
    %66 = vector.broadcast %11 : vector<1x128xf32> to vector<8x128xf32>
    %67 = arith.addf %65, %66 : vector<8x128xf32>
    %cst_27 = arith.constant dense<0.000000e+00> : vector<8x64xf32>
    %68 = tpu.matmul %64, %1, %cst_27 {dimension_numbers = #tpu.dot_dimension_numbers<[1], [0], [0], [1], [0, 0, 1, 1], [], []>} : vector<8x32xf32>, vector<32x64xf32>, vector<8x64xf32> -> vector<8x64xf32>
    %69 = vector.broadcast %12 : vector<1x64xf32> to vector<8x64xf32>
    %70 = arith.addf %68, %69 : vector<8x64xf32>
    %71 = vector.extract_strided_slice %4 {offsets = [0, 0], sizes = [1, 32], strides = [1, 1]} : vector<4x32xf32> to vector<1x32xf32>
    %72 = vector.broadcast %71 : vector<1x32xf32> to vector<8x32xf32>
    %73 = arith.mulf %46, %72 : vector<8x32xf32>
    %74 = vector.extract_strided_slice %4 {offsets = [1, 0], sizes = [1, 32], strides = [1, 1]} : vector<4x32xf32> to vector<1x32xf32>
    %75 = vector.broadcast %74 : vector<1x32xf32> to vector<8x32xf32>
    %76 = arith.addf %73, %75 : vector<8x32xf32>
    %77 = vector.extract_strided_slice %67 {offsets = [0, 0], sizes = [8, 32], strides = [1, 1]} : vector<8x128xf32> to vector<8x32xf32>
    %78 = vector.extract_strided_slice %70 {offsets = [0, 0], sizes = [8, 32], strides = [1, 1]} : vector<8x64xf32> to vector<8x32xf32>
    %79 = vector.extract_strided_slice %70 {offsets = [0, 32], sizes = [8, 32], strides = [1, 1]} : vector<8x64xf32> to vector<8x32xf32>
    %80 = vector.extract_strided_slice %77 {offsets = [0, 0], sizes = [8, 8], strides = [1, 1]} : vector<8x32xf32> to vector<8x8xf32>
    %81 = vector.extract_strided_slice %78 {offsets = [0, 0], sizes = [8, 8], strides = [1, 1]} : vector<8x32xf32> to vector<8x8xf32>
    %82 = vector.extract_strided_slice %79 {offsets = [0, 0], sizes = [8, 8], strides = [1, 1]} : vector<8x32xf32> to vector<8x8xf32>
    %cst_28 = arith.constant dense<0.000000e+00> : vector<8x8xf32>
    %83 = tpu.matmul %80, %81, %cst_28 {dimension_numbers = #tpu.dot_dimension_numbers<[1], [1], [0], [0], [0, 0, 1, 0], [], []>} : vector<8x8xf32>, vector<8x8xf32>, vector<8x8xf32> -> vector<8x8xf32>
    %cst_29 = arith.constant dense<0xFF800000> : vector<8xf32>
    %84 = vector.multi_reduction <maximumf>, %83, %cst_29 [1] : vector<8x8xf32> to vector<8xf32>
    %85 = vector.shape_cast %84 : vector<8xf32> to vector<8x1xf32>
    %86 = vector.broadcast %85 : vector<8x1xf32> to vector<8x8xf32>
    %87 = arith.subf %83, %86 : vector<8x8xf32>
    %88 = math.exp %87 : vector<8x8xf32>
    %cst_30 = arith.constant dense<0.000000e+00> : vector<8xf32>
    %89 = vector.multi_reduction <add>, %88, %cst_30 [1] : vector<8x8xf32> to vector<8xf32>
    %90 = vector.shape_cast %89 : vector<8xf32> to vector<8x1xf32>
    %91 = vector.broadcast %90 : vector<8x1xf32> to vector<8x8xf32>
    %92 = arith.divf %88, %91 : vector<8x8xf32>
    %cst_31 = arith.constant dense<0.000000e+00> : vector<8x8xf32>
    %93 = tpu.matmul %92, %82, %cst_31 {dimension_numbers = #tpu.dot_dimension_numbers<[1], [0], [0], [1], [0, 0, 1, 1], [], []>} : vector<8x8xf32>, vector<8x8xf32>, vector<8x8xf32> -> vector<8x8xf32>
    %94 = vector.extract_strided_slice %77 {offsets = [0, 8], sizes = [8, 8], strides = [1, 1]} : vector<8x32xf32> to vector<8x8xf32>
    %95 = vector.extract_strided_slice %78 {offsets = [0, 8], sizes = [8, 8], strides = [1, 1]} : vector<8x32xf32> to vector<8x8xf32>
    %96 = vector.extract_strided_slice %79 {offsets = [0, 8], sizes = [8, 8], strides = [1, 1]} : vector<8x32xf32> to vector<8x8xf32>
    %cst_32 = arith.constant dense<0.000000e+00> : vector<8x8xf32>
    %97 = tpu.matmul %94, %95, %cst_32 {dimension_numbers = #tpu.dot_dimension_numbers<[1], [1], [0], [0], [0, 0, 1, 0], [], []>} : vector<8x8xf32>, vector<8x8xf32>, vector<8x8xf32> -> vector<8x8xf32>
    %cst_33 = arith.constant dense<0xFF800000> : vector<8xf32>
    %98 = vector.multi_reduction <maximumf>, %97, %cst_33 [1] : vector<8x8xf32> to vector<8xf32>
    %99 = vector.shape_cast %98 : vector<8xf32> to vector<8x1xf32>
    %100 = vector.broadcast %99 : vector<8x1xf32> to vector<8x8xf32>
    %101 = arith.subf %97, %100 : vector<8x8xf32>
    %102 = math.exp %101 : vector<8x8xf32>
    %cst_34 = arith.constant dense<0.000000e+00> : vector<8xf32>
    %103 = vector.multi_reduction <add>, %102, %cst_34 [1] : vector<8x8xf32> to vector<8xf32>
    %104 = vector.shape_cast %103 : vector<8xf32> to vector<8x1xf32>
    %105 = vector.broadcast %104 : vector<8x1xf32> to vector<8x8xf32>
    %106 = arith.divf %102, %105 : vector<8x8xf32>
    %cst_35 = arith.constant dense<0.000000e+00> : vector<8x8xf32>
    %107 = tpu.matmul %106, %96, %cst_35 {dimension_numbers = #tpu.dot_dimension_numbers<[1], [0], [0], [1], [0, 0, 1, 1], [], []>} : vector<8x8xf32>, vector<8x8xf32>, vector<8x8xf32> -> vector<8x8xf32>
    %108 = vector.extract_strided_slice %77 {offsets = [0, 16], sizes = [8, 8], strides = [1, 1]} : vector<8x32xf32> to vector<8x8xf32>
    %109 = vector.extract_strided_slice %78 {offsets = [0, 16], sizes = [8, 8], strides = [1, 1]} : vector<8x32xf32> to vector<8x8xf32>
    %110 = vector.extract_strided_slice %79 {offsets = [0, 16], sizes = [8, 8], strides = [1, 1]} : vector<8x32xf32> to vector<8x8xf32>
    %cst_36 = arith.constant dense<0.000000e+00> : vector<8x8xf32>
    %111 = tpu.matmul %108, %109, %cst_36 {dimension_numbers = #tpu.dot_dimension_numbers<[1], [1], [0], [0], [0, 0, 1, 0], [], []>} : vector<8x8xf32>, vector<8x8xf32>, vector<8x8xf32> -> vector<8x8xf32>
    %cst_37 = arith.constant dense<0xFF800000> : vector<8xf32>
    %112 = vector.multi_reduction <maximumf>, %111, %cst_37 [1] : vector<8x8xf32> to vector<8xf32>
    %113 = vector.shape_cast %112 : vector<8xf32> to vector<8x1xf32>
    %114 = vector.broadcast %113 : vector<8x1xf32> to vector<8x8xf32>
    %115 = arith.subf %111, %114 : vector<8x8xf32>
    %116 = math.exp %115 : vector<8x8xf32>
    %cst_38 = arith.constant dense<0.000000e+00> : vector<8xf32>
    %117 = vector.multi_reduction <add>, %116, %cst_38 [1] : vector<8x8xf32> to vector<8xf32>
    %118 = vector.shape_cast %117 : vector<8xf32> to vector<8x1xf32>
    %119 = vector.broadcast %118 : vector<8x1xf32> to vector<8x8xf32>
    %120 = arith.divf %116, %119 : vector<8x8xf32>
    %cst_39 = arith.constant dense<0.000000e+00> : vector<8x8xf32>
    %121 = tpu.matmul %120, %110, %cst_39 {dimension_numbers = #tpu.dot_dimension_numbers<[1], [0], [0], [1], [0, 0, 1, 1], [], []>} : vector<8x8xf32>, vector<8x8xf32>, vector<8x8xf32> -> vector<8x8xf32>
    %122 = vector.extract_strided_slice %77 {offsets = [0, 24], sizes = [8, 8], strides = [1, 1]} : vector<8x32xf32> to vector<8x8xf32>
    %123 = vector.extract_strided_slice %78 {offsets = [0, 24], sizes = [8, 8], strides = [1, 1]} : vector<8x32xf32> to vector<8x8xf32>
    %124 = vector.extract_strided_slice %79 {offsets = [0, 24], sizes = [8, 8], strides = [1, 1]} : vector<8x32xf32> to vector<8x8xf32>
    %cst_40 = arith.constant dense<0.000000e+00> : vector<8x8xf32>
    %125 = tpu.matmul %122, %123, %cst_40 {dimension_numbers = #tpu.dot_dimension_numbers<[1], [1], [0], [0], [0, 0, 1, 0], [], []>} : vector<8x8xf32>, vector<8x8xf32>, vector<8x8xf32> -> vector<8x8xf32>
    %cst_41 = arith.constant dense<0xFF800000> : vector<8xf32>
    %126 = vector.multi_reduction <maximumf>, %125, %cst_41 [1] : vector<8x8xf32> to vector<8xf32>
    %127 = vector.shape_cast %126 : vector<8xf32> to vector<8x1xf32>
    %128 = vector.broadcast %127 : vector<8x1xf32> to vector<8x8xf32>
    %129 = arith.subf %125, %128 : vector<8x8xf32>
    %130 = math.exp %129 : vector<8x8xf32>
    %cst_42 = arith.constant dense<0.000000e+00> : vector<8xf32>
    %131 = vector.multi_reduction <add>, %130, %cst_42 [1] : vector<8x8xf32> to vector<8xf32>
    %132 = vector.shape_cast %131 : vector<8xf32> to vector<8x1xf32>
    %133 = vector.broadcast %132 : vector<8x1xf32> to vector<8x8xf32>
    %134 = arith.divf %130, %133 : vector<8x8xf32>
    %cst_43 = arith.constant dense<0.000000e+00> : vector<8x8xf32>
    %135 = tpu.matmul %134, %124, %cst_43 {dimension_numbers = #tpu.dot_dimension_numbers<[1], [0], [0], [1], [0, 0, 1, 1], [], []>} : vector<8x8xf32>, vector<8x8xf32>, vector<8x8xf32> -> vector<8x8xf32>
    %136 = tpu.concatenate %93, %107, %121, %135 in 1 : vector<8x8xf32>, vector<8x8xf32>, vector<8x8xf32>, vector<8x8xf32> -> vector<8x32xf32>
    %cst_44 = arith.constant dense<0.000000e+00> : vector<8x32xf32>
    %137 = tpu.matmul %136, %7, %cst_44 {dimension_numbers = #tpu.dot_dimension_numbers<[1], [0], [0], [1], [0, 0, 1, 1], [], []>} : vector<8x32xf32>, vector<32x32xf32>, vector<8x32xf32> -> vector<8x32xf32>
    %138 = tpu.concatenate %76, %137 in 1 : vector<8x32xf32>, vector<8x32xf32> -> vector<8x64xf32>
    %cst_45 = arith.constant dense<0.000000e+00> : vector<8x32xf32>
    %139 = tpu.matmul %138, %9, %cst_45 {dimension_numbers = #tpu.dot_dimension_numbers<[1], [0], [0], [1], [0, 0, 1, 1], [], []>} : vector<8x64xf32>, vector<64x32xf32>, vector<8x32xf32> -> vector<8x32xf32>
    %140 = vector.broadcast %15 : vector<1x32xf32> to vector<8x32xf32>
    %141 = arith.addf %139, %140 : vector<8x32xf32>
    %142 = arith.negf %141 : vector<8x32xf32>
    %143 = math.exp %142 : vector<8x32xf32>
    %cst_46 = arith.constant 1.000000e+00 : f32
    %144 = vector.broadcast %cst_46 : f32 to vector<8x32xf32>
    %145 = arith.addf %144, %143 : vector<8x32xf32>
    %146 = arith.divf %144, %145 : vector<8x32xf32>
    %147 = arith.mulf %146, %76 : vector<8x32xf32>
    %cst_47 = arith.constant 1.000000e+00 : f32
    %148 = vector.broadcast %cst_47 : f32 to vector<8x32xf32>
    %149 = arith.subf %148, %146 : vector<8x32xf32>
    %150 = arith.mulf %149, %137 : vector<8x32xf32>
    %151 = arith.addf %147, %150 : vector<8x32xf32>
    %152 = vector.extract_strided_slice %4 {offsets = [2, 0], sizes = [1, 32], strides = [1, 1]} : vector<4x32xf32> to vector<1x32xf32>
    %153 = vector.broadcast %152 : vector<1x32xf32> to vector<8x32xf32>
    %154 = arith.mulf %46, %153 : vector<8x32xf32>
    %155 = vector.extract_strided_slice %4 {offsets = [3, 0], sizes = [1, 32], strides = [1, 1]} : vector<4x32xf32> to vector<1x32xf32>
    %156 = vector.broadcast %155 : vector<1x32xf32> to vector<8x32xf32>
    %157 = arith.addf %154, %156 : vector<8x32xf32>
    %158 = vector.extract_strided_slice %67 {offsets = [0, 32], sizes = [8, 32], strides = [1, 1]} : vector<8x128xf32> to vector<8x32xf32>
    %159 = vector.extract_strided_slice %67 {offsets = [0, 64], sizes = [8, 32], strides = [1, 1]} : vector<8x128xf32> to vector<8x32xf32>
    %160 = vector.extract_strided_slice %67 {offsets = [0, 96], sizes = [8, 32], strides = [1, 1]} : vector<8x128xf32> to vector<8x32xf32>
    %161 = vector.extract_strided_slice %158 {offsets = [0, 0], sizes = [8, 8], strides = [1, 1]} : vector<8x32xf32> to vector<8x8xf32>
    %162 = vector.extract_strided_slice %159 {offsets = [0, 0], sizes = [8, 8], strides = [1, 1]} : vector<8x32xf32> to vector<8x8xf32>
    %163 = vector.extract_strided_slice %160 {offsets = [0, 0], sizes = [8, 8], strides = [1, 1]} : vector<8x32xf32> to vector<8x8xf32>
    %cst_48 = arith.constant dense<0.000000e+00> : vector<8x8xf32>
    %164 = tpu.matmul %161, %162, %cst_48 {dimension_numbers = #tpu.dot_dimension_numbers<[1], [1], [0], [0], [0, 0, 1, 0], [], []>} : vector<8x8xf32>, vector<8x8xf32>, vector<8x8xf32> -> vector<8x8xf32>
    %cst_49 = arith.constant dense<0xFF800000> : vector<8xf32>
    %165 = vector.multi_reduction <maximumf>, %164, %cst_49 [1] : vector<8x8xf32> to vector<8xf32>
    %166 = vector.shape_cast %165 : vector<8xf32> to vector<8x1xf32>
    %167 = vector.broadcast %166 : vector<8x1xf32> to vector<8x8xf32>
    %168 = arith.subf %164, %167 : vector<8x8xf32>
    %169 = math.exp %168 : vector<8x8xf32>
    %cst_50 = arith.constant dense<0.000000e+00> : vector<8xf32>
    %170 = vector.multi_reduction <add>, %169, %cst_50 [1] : vector<8x8xf32> to vector<8xf32>
    %171 = vector.shape_cast %170 : vector<8xf32> to vector<8x1xf32>
    %172 = vector.broadcast %171 : vector<8x1xf32> to vector<8x8xf32>
    %173 = arith.divf %169, %172 : vector<8x8xf32>
    %cst_51 = arith.constant dense<0.000000e+00> : vector<8x8xf32>
    %174 = tpu.matmul %173, %163, %cst_51 {dimension_numbers = #tpu.dot_dimension_numbers<[1], [0], [0], [1], [0, 0, 1, 1], [], []>} : vector<8x8xf32>, vector<8x8xf32>, vector<8x8xf32> -> vector<8x8xf32>
    %175 = vector.extract_strided_slice %158 {offsets = [0, 8], sizes = [8, 8], strides = [1, 1]} : vector<8x32xf32> to vector<8x8xf32>
    %176 = vector.extract_strided_slice %159 {offsets = [0, 8], sizes = [8, 8], strides = [1, 1]} : vector<8x32xf32> to vector<8x8xf32>
    %177 = vector.extract_strided_slice %160 {offsets = [0, 8], sizes = [8, 8], strides = [1, 1]} : vector<8x32xf32> to vector<8x8xf32>
    %cst_52 = arith.constant dense<0.000000e+00> : vector<8x8xf32>
    %178 = tpu.matmul %175, %176, %cst_52 {dimension_numbers = #tpu.dot_dimension_numbers<[1], [1], [0], [0], [0, 0, 1, 0], [], []>} : vector<8x8xf32>, vector<8x8xf32>, vector<8x8xf32> -> vector<8x8xf32>
    %cst_53 = arith.constant dense<0xFF800000> : vector<8xf32>
    %179 = vector.multi_reduction <maximumf>, %178, %cst_53 [1] : vector<8x8xf32> to vector<8xf32>
    %180 = vector.shape_cast %179 : vector<8xf32> to vector<8x1xf32>
    %181 = vector.broadcast %180 : vector<8x1xf32> to vector<8x8xf32>
    %182 = arith.subf %178, %181 : vector<8x8xf32>
    %183 = math.exp %182 : vector<8x8xf32>
    %cst_54 = arith.constant dense<0.000000e+00> : vector<8xf32>
    %184 = vector.multi_reduction <add>, %183, %cst_54 [1] : vector<8x8xf32> to vector<8xf32>
    %185 = vector.shape_cast %184 : vector<8xf32> to vector<8x1xf32>
    %186 = vector.broadcast %185 : vector<8x1xf32> to vector<8x8xf32>
    %187 = arith.divf %183, %186 : vector<8x8xf32>
    %cst_55 = arith.constant dense<0.000000e+00> : vector<8x8xf32>
    %188 = tpu.matmul %187, %177, %cst_55 {dimension_numbers = #tpu.dot_dimension_numbers<[1], [0], [0], [1], [0, 0, 1, 1], [], []>} : vector<8x8xf32>, vector<8x8xf32>, vector<8x8xf32> -> vector<8x8xf32>
    %189 = vector.extract_strided_slice %158 {offsets = [0, 16], sizes = [8, 8], strides = [1, 1]} : vector<8x32xf32> to vector<8x8xf32>
    %190 = vector.extract_strided_slice %159 {offsets = [0, 16], sizes = [8, 8], strides = [1, 1]} : vector<8x32xf32> to vector<8x8xf32>
    %191 = vector.extract_strided_slice %160 {offsets = [0, 16], sizes = [8, 8], strides = [1, 1]} : vector<8x32xf32> to vector<8x8xf32>
    %cst_56 = arith.constant dense<0.000000e+00> : vector<8x8xf32>
    %192 = tpu.matmul %189, %190, %cst_56 {dimension_numbers = #tpu.dot_dimension_numbers<[1], [1], [0], [0], [0, 0, 1, 0], [], []>} : vector<8x8xf32>, vector<8x8xf32>, vector<8x8xf32> -> vector<8x8xf32>
    %cst_57 = arith.constant dense<0xFF800000> : vector<8xf32>
    %193 = vector.multi_reduction <maximumf>, %192, %cst_57 [1] : vector<8x8xf32> to vector<8xf32>
    %194 = vector.shape_cast %193 : vector<8xf32> to vector<8x1xf32>
    %195 = vector.broadcast %194 : vector<8x1xf32> to vector<8x8xf32>
    %196 = arith.subf %192, %195 : vector<8x8xf32>
    %197 = math.exp %196 : vector<8x8xf32>
    %cst_58 = arith.constant dense<0.000000e+00> : vector<8xf32>
    %198 = vector.multi_reduction <add>, %197, %cst_58 [1] : vector<8x8xf32> to vector<8xf32>
    %199 = vector.shape_cast %198 : vector<8xf32> to vector<8x1xf32>
    %200 = vector.broadcast %199 : vector<8x1xf32> to vector<8x8xf32>
    %201 = arith.divf %197, %200 : vector<8x8xf32>
    %cst_59 = arith.constant dense<0.000000e+00> : vector<8x8xf32>
    %202 = tpu.matmul %201, %191, %cst_59 {dimension_numbers = #tpu.dot_dimension_numbers<[1], [0], [0], [1], [0, 0, 1, 1], [], []>} : vector<8x8xf32>, vector<8x8xf32>, vector<8x8xf32> -> vector<8x8xf32>
    %203 = vector.extract_strided_slice %158 {offsets = [0, 24], sizes = [8, 8], strides = [1, 1]} : vector<8x32xf32> to vector<8x8xf32>
    %204 = vector.extract_strided_slice %159 {offsets = [0, 24], sizes = [8, 8], strides = [1, 1]} : vector<8x32xf32> to vector<8x8xf32>
    %205 = vector.extract_strided_slice %160 {offsets = [0, 24], sizes = [8, 8], strides = [1, 1]} : vector<8x32xf32> to vector<8x8xf32>
    %cst_60 = arith.constant dense<0.000000e+00> : vector<8x8xf32>
    %206 = tpu.matmul %203, %204, %cst_60 {dimension_numbers = #tpu.dot_dimension_numbers<[1], [1], [0], [0], [0, 0, 1, 0], [], []>} : vector<8x8xf32>, vector<8x8xf32>, vector<8x8xf32> -> vector<8x8xf32>
    %cst_61 = arith.constant dense<0xFF800000> : vector<8xf32>
    %207 = vector.multi_reduction <maximumf>, %206, %cst_61 [1] : vector<8x8xf32> to vector<8xf32>
    %208 = vector.shape_cast %207 : vector<8xf32> to vector<8x1xf32>
    %209 = vector.broadcast %208 : vector<8x1xf32> to vector<8x8xf32>
    %210 = arith.subf %206, %209 : vector<8x8xf32>
    %211 = math.exp %210 : vector<8x8xf32>
    %cst_62 = arith.constant dense<0.000000e+00> : vector<8xf32>
    %212 = vector.multi_reduction <add>, %211, %cst_62 [1] : vector<8x8xf32> to vector<8xf32>
    %213 = vector.shape_cast %212 : vector<8xf32> to vector<8x1xf32>
    %214 = vector.broadcast %213 : vector<8x1xf32> to vector<8x8xf32>
    %215 = arith.divf %211, %214 : vector<8x8xf32>
    %cst_63 = arith.constant dense<0.000000e+00> : vector<8x8xf32>
    %216 = tpu.matmul %215, %205, %cst_63 {dimension_numbers = #tpu.dot_dimension_numbers<[1], [0], [0], [1], [0, 0, 1, 1], [], []>} : vector<8x8xf32>, vector<8x8xf32>, vector<8x8xf32> -> vector<8x8xf32>
    %217 = tpu.concatenate %174, %188, %202, %216 in 1 : vector<8x8xf32>, vector<8x8xf32>, vector<8x8xf32>, vector<8x8xf32> -> vector<8x32xf32>
    %cst_64 = arith.constant dense<0.000000e+00> : vector<8x32xf32>
    %218 = tpu.matmul %217, %8, %cst_64 {dimension_numbers = #tpu.dot_dimension_numbers<[1], [0], [0], [1], [0, 0, 1, 1], [], []>} : vector<8x32xf32>, vector<32x32xf32>, vector<8x32xf32> -> vector<8x32xf32>
    %219 = tpu.concatenate %157, %218 in 1 : vector<8x32xf32>, vector<8x32xf32> -> vector<8x64xf32>
    %cst_65 = arith.constant dense<0.000000e+00> : vector<8x32xf32>
    %220 = tpu.matmul %219, %10, %cst_65 {dimension_numbers = #tpu.dot_dimension_numbers<[1], [0], [0], [1], [0, 0, 1, 1], [], []>} : vector<8x64xf32>, vector<64x32xf32>, vector<8x32xf32> -> vector<8x32xf32>
    %221 = vector.broadcast %16 : vector<1x32xf32> to vector<8x32xf32>
    %222 = arith.addf %220, %221 : vector<8x32xf32>
    %223 = arith.negf %222 : vector<8x32xf32>
    %224 = math.exp %223 : vector<8x32xf32>
    %cst_66 = arith.constant 1.000000e+00 : f32
    %225 = vector.broadcast %cst_66 : f32 to vector<8x32xf32>
    %226 = arith.addf %225, %224 : vector<8x32xf32>
    %227 = arith.divf %225, %226 : vector<8x32xf32>
    %228 = arith.mulf %227, %157 : vector<8x32xf32>
    %cst_67 = arith.constant 1.000000e+00 : f32
    %229 = vector.broadcast %cst_67 : f32 to vector<8x32xf32>
    %230 = arith.subf %229, %227 : vector<8x32xf32>
    %231 = arith.mulf %230, %218 : vector<8x32xf32>
    %232 = arith.addf %228, %231 : vector<8x32xf32>
    %233 = tpu.concatenate %25, %28, %151, %232 in 1 : vector<8x32xf32>, vector<8x32xf32>, vector<8x32xf32>, vector<8x32xf32> -> vector<8x128xf32>
    %c0_68 = arith.constant 0 : index
    %c0_69 = arith.constant 0 : index
    %c0_70 = arith.constant 0 : index
    %234 = vector.load %arg7[%c0_68, %c0_69, %c0_70] : memref<2x8x128xf32, #tpu.memory_space<vmem>>, vector<1x8x128xf32>
    %235 = vector.shape_cast %234 : vector<1x8x128xf32> to vector<8x128xf32>
    %236 = vector.shape_cast %233 : vector<8x128xf32> to vector<1x8x128xf32>
    tpu.vector_store %arg7[%c0_68, %c0_69, %c0_70], %236 {strides = array<i32>} : memref<2x8x128xf32, #tpu.memory_space<vmem>>, vector<1x8x128xf32>,
    %237 = vector.extract_strided_slice %17 {offsets = [1, 0, 0], sizes = [1, 8, 32], strides = [1, 1, 1]} : vector<2x8x32xf32> to vector<1x8x32xf32>
    %238 = vector.shape_cast %237 : vector<1x8x32xf32> to vector<8x32xf32>
    %239 = vector.extract_strided_slice %18 {offsets = [1, 0, 0], sizes = [1, 8, 32], strides = [1, 1, 1]} : vector<2x8x32xf32> to vector<1x8x32xf32>
    %240 = vector.shape_cast %239 : vector<1x8x32xf32> to vector<8x32xf32>
    %cst_71 = arith.constant dense<0.000000e+00> : vector<8x32xf32>
    %241 = tpu.matmul %238, %5, %cst_71 {dimension_numbers = #tpu.dot_dimension_numbers<[1], [0], [0], [1], [0, 0, 1, 1], [], []>} : vector<8x32xf32>, vector<32x32xf32>, vector<8x32xf32> -> vector<8x32xf32>
    %242 = vector.broadcast %13 : vector<1x32xf32> to vector<8x32xf32>
    %243 = arith.addf %241, %242 : vector<8x32xf32>
    %cst_72 = arith.constant dense<0.000000e+00> : vector<8x32xf32>
    %244 = tpu.matmul %240, %6, %cst_72 {dimension_numbers = #tpu.dot_dimension_numbers<[1], [0], [0], [1], [0, 0, 1, 1], [], []>} : vector<8x32xf32>, vector<32x32xf32>, vector<8x32xf32> -> vector<8x32xf32>
    %245 = vector.broadcast %14 : vector<1x32xf32> to vector<8x32xf32>
    %246 = arith.addf %244, %245 : vector<8x32xf32>
    %cst_73 = arith.constant dense<0.000000e+00> : vector<8xf32>
    %247 = vector.multi_reduction <add>, %240, %cst_73 [1] : vector<8x32xf32> to vector<8xf32>
    %248 = vector.shape_cast %247 : vector<8xf32> to vector<8x1xf32>
    %cst_74 = arith.constant 3.200000e+01 : f32
    %249 = vector.broadcast %cst_74 : f32 to vector<8x1xf32>
    %250 = arith.divf %248, %249 : vector<8x1xf32>
    %251 = vector.broadcast %250 : vector<8x1xf32> to vector<8x32xf32>
    %252 = arith.subf %240, %251 : vector<8x32xf32>
    %253 = arith.mulf %252, %252 : vector<8x32xf32>
    %cst_75 = arith.constant dense<0.000000e+00> : vector<8xf32>
    %254 = vector.multi_reduction <add>, %253, %cst_75 [1] : vector<8x32xf32> to vector<8xf32>
    %255 = vector.shape_cast %254 : vector<8xf32> to vector<8x1xf32>
    %cst_76 = arith.constant 3.200000e+01 : f32
    %256 = vector.broadcast %cst_76 : f32 to vector<8x1xf32>
    %257 = arith.divf %255, %256 : vector<8x1xf32>
    %258 = vector.broadcast %250 : vector<8x1xf32> to vector<8x32xf32>
    %259 = arith.subf %240, %258 : vector<8x32xf32>
    %cst_77 = arith.constant 9.99999974E-6 : f32
    %260 = vector.broadcast %cst_77 : f32 to vector<8x1xf32>
    %261 = arith.addf %257, %260 : vector<8x1xf32>
    %262 = math.rsqrt %261 : vector<8x1xf32>
    %263 = vector.broadcast %262 : vector<8x1xf32> to vector<8x32xf32>
    %264 = arith.mulf %259, %263 : vector<8x32xf32>
    %cst_78 = arith.constant dense<0.000000e+00> : vector<8xf32>
    %265 = vector.multi_reduction <add>, %238, %cst_78 [1] : vector<8x32xf32> to vector<8xf32>
    %266 = vector.shape_cast %265 : vector<8xf32> to vector<8x1xf32>
    %cst_79 = arith.constant 3.200000e+01 : f32
    %267 = vector.broadcast %cst_79 : f32 to vector<8x1xf32>
    %268 = arith.divf %266, %267 : vector<8x1xf32>
    %269 = vector.broadcast %268 : vector<8x1xf32> to vector<8x32xf32>
    %270 = arith.subf %238, %269 : vector<8x32xf32>
    %271 = arith.mulf %270, %270 : vector<8x32xf32>
    %cst_80 = arith.constant dense<0.000000e+00> : vector<8xf32>
    %272 = vector.multi_reduction <add>, %271, %cst_80 [1] : vector<8x32xf32> to vector<8xf32>
    %273 = vector.shape_cast %272 : vector<8xf32> to vector<8x1xf32>
    %cst_81 = arith.constant 3.200000e+01 : f32
    %274 = vector.broadcast %cst_81 : f32 to vector<8x1xf32>
    %275 = arith.divf %273, %274 : vector<8x1xf32>
    %276 = vector.broadcast %268 : vector<8x1xf32> to vector<8x32xf32>
    %277 = arith.subf %238, %276 : vector<8x32xf32>
    %cst_82 = arith.constant 9.99999974E-6 : f32
    %278 = vector.broadcast %cst_82 : f32 to vector<8x1xf32>
    %279 = arith.addf %275, %278 : vector<8x1xf32>
    %280 = math.rsqrt %279 : vector<8x1xf32>
    %281 = vector.broadcast %280 : vector<8x1xf32> to vector<8x32xf32>
    %282 = arith.mulf %277, %281 : vector<8x32xf32>
    %cst_83 = arith.constant dense<0.000000e+00> : vector<8x128xf32>
    %283 = tpu.matmul %264, %0, %cst_83 {dimension_numbers = #tpu.dot_dimension_numbers<[1], [0], [0], [1], [0, 0, 1, 1], [], []>} : vector<8x32xf32>, vector<32x128xf32>, vector<8x128xf32> -> vector<8x128xf32>
    %284 = vector.broadcast %11 : vector<1x128xf32> to vector<8x128xf32>
    %285 = arith.addf %283, %284 : vector<8x128xf32>
    %cst_84 = arith.constant dense<0.000000e+00> : vector<8x64xf32>
    %286 = tpu.matmul %282, %1, %cst_84 {dimension_numbers = #tpu.dot_dimension_numbers<[1], [0], [0], [1], [0, 0, 1, 1], [], []>} : vector<8x32xf32>, vector<32x64xf32>, vector<8x64xf32> -> vector<8x64xf32>
    %287 = vector.broadcast %12 : vector<1x64xf32> to vector<8x64xf32>
    %288 = arith.addf %286, %287 : vector<8x64xf32>
    %289 = vector.extract_strided_slice %4 {offsets = [0, 0], sizes = [1, 32], strides = [1, 1]} : vector<4x32xf32> to vector<1x32xf32>
    %290 = vector.broadcast %289 : vector<1x32xf32> to vector<8x32xf32>
    %291 = arith.mulf %264, %290 : vector<8x32xf32>
    %292 = vector.extract_strided_slice %4 {offsets = [1, 0], sizes = [1, 32], strides = [1, 1]} : vector<4x32xf32> to vector<1x32xf32>
    %293 = vector.broadcast %292 : vector<1x32xf32> to vector<8x32xf32>
    %294 = arith.addf %291, %293 : vector<8x32xf32>
    %295 = vector.extract_strided_slice %285 {offsets = [0, 0], sizes = [8, 32], strides = [1, 1]} : vector<8x128xf32> to vector<8x32xf32>
    %296 = vector.extract_strided_slice %288 {offsets = [0, 0], sizes = [8, 32], strides = [1, 1]} : vector<8x64xf32> to vector<8x32xf32>
    %297 = vector.extract_strided_slice %288 {offsets = [0, 32], sizes = [8, 32], strides = [1, 1]} : vector<8x64xf32> to vector<8x32xf32>
    %298 = vector.extract_strided_slice %295 {offsets = [0, 0], sizes = [8, 8], strides = [1, 1]} : vector<8x32xf32> to vector<8x8xf32>
    %299 = vector.extract_strided_slice %296 {offsets = [0, 0], sizes = [8, 8], strides = [1, 1]} : vector<8x32xf32> to vector<8x8xf32>
    %300 = vector.extract_strided_slice %297 {offsets = [0, 0], sizes = [8, 8], strides = [1, 1]} : vector<8x32xf32> to vector<8x8xf32>
    %cst_85 = arith.constant dense<0.000000e+00> : vector<8x8xf32>
    %301 = tpu.matmul %298, %299, %cst_85 {dimension_numbers = #tpu.dot_dimension_numbers<[1], [1], [0], [0], [0, 0, 1, 0], [], []>} : vector<8x8xf32>, vector<8x8xf32>, vector<8x8xf32> -> vector<8x8xf32>
    %cst_86 = arith.constant dense<0xFF800000> : vector<8xf32>
    %302 = vector.multi_reduction <maximumf>, %301, %cst_86 [1] : vector<8x8xf32> to vector<8xf32>
    %303 = vector.shape_cast %302 : vector<8xf32> to vector<8x1xf32>
    %304 = vector.broadcast %303 : vector<8x1xf32> to vector<8x8xf32>
    %305 = arith.subf %301, %304 : vector<8x8xf32>
    %306 = math.exp %305 : vector<8x8xf32>
    %cst_87 = arith.constant dense<0.000000e+00> : vector<8xf32>
    %307 = vector.multi_reduction <add>, %306, %cst_87 [1] : vector<8x8xf32> to vector<8xf32>
    %308 = vector.shape_cast %307 : vector<8xf32> to vector<8x1xf32>
    %309 = vector.broadcast %308 : vector<8x1xf32> to vector<8x8xf32>
    %310 = arith.divf %306, %309 : vector<8x8xf32>
    %cst_88 = arith.constant dense<0.000000e+00> : vector<8x8xf32>
    %311 = tpu.matmul %310, %300, %cst_88 {dimension_numbers = #tpu.dot_dimension_numbers<[1], [0], [0], [1], [0, 0, 1, 1], [], []>} : vector<8x8xf32>, vector<8x8xf32>, vector<8x8xf32> -> vector<8x8xf32>
    %312 = vector.extract_strided_slice %295 {offsets = [0, 8], sizes = [8, 8], strides = [1, 1]} : vector<8x32xf32> to vector<8x8xf32>
    %313 = vector.extract_strided_slice %296 {offsets = [0, 8], sizes = [8, 8], strides = [1, 1]} : vector<8x32xf32> to vector<8x8xf32>
    %314 = vector.extract_strided_slice %297 {offsets = [0, 8], sizes = [8, 8], strides = [1, 1]} : vector<8x32xf32> to vector<8x8xf32>
    %cst_89 = arith.constant dense<0.000000e+00> : vector<8x8xf32>
    %315 = tpu.matmul %312, %313, %cst_89 {dimension_numbers = #tpu.dot_dimension_numbers<[1], [1], [0], [0], [0, 0, 1, 0], [], []>} : vector<8x8xf32>, vector<8x8xf32>, vector<8x8xf32> -> vector<8x8xf32>
    %cst_90 = arith.constant dense<0xFF800000> : vector<8xf32>
    %316 = vector.multi_reduction <maximumf>, %315, %cst_90 [1] : vector<8x8xf32> to vector<8xf32>
    %317 = vector.shape_cast %316 : vector<8xf32> to vector<8x1xf32>
    %318 = vector.broadcast %317 : vector<8x1xf32> to vector<8x8xf32>
    %319 = arith.subf %315, %318 : vector<8x8xf32>
    %320 = math.exp %319 : vector<8x8xf32>
    %cst_91 = arith.constant dense<0.000000e+00> : vector<8xf32>
    %321 = vector.multi_reduction <add>, %320, %cst_91 [1] : vector<8x8xf32> to vector<8xf32>
    %322 = vector.shape_cast %321 : vector<8xf32> to vector<8x1xf32>
    %323 = vector.broadcast %322 : vector<8x1xf32> to vector<8x8xf32>
    %324 = arith.divf %320, %323 : vector<8x8xf32>
    %cst_92 = arith.constant dense<0.000000e+00> : vector<8x8xf32>
    %325 = tpu.matmul %324, %314, %cst_92 {dimension_numbers = #tpu.dot_dimension_numbers<[1], [0], [0], [1], [0, 0, 1, 1], [], []>} : vector<8x8xf32>, vector<8x8xf32>, vector<8x8xf32> -> vector<8x8xf32>
    %326 = vector.extract_strided_slice %295 {offsets = [0, 16], sizes = [8, 8], strides = [1, 1]} : vector<8x32xf32> to vector<8x8xf32>
    %327 = vector.extract_strided_slice %296 {offsets = [0, 16], sizes = [8, 8], strides = [1, 1]} : vector<8x32xf32> to vector<8x8xf32>
    %328 = vector.extract_strided_slice %297 {offsets = [0, 16], sizes = [8, 8], strides = [1, 1]} : vector<8x32xf32> to vector<8x8xf32>
    %cst_93 = arith.constant dense<0.000000e+00> : vector<8x8xf32>
    %329 = tpu.matmul %326, %327, %cst_93 {dimension_numbers = #tpu.dot_dimension_numbers<[1], [1], [0], [0], [0, 0, 1, 0], [], []>} : vector<8x8xf32>, vector<8x8xf32>, vector<8x8xf32> -> vector<8x8xf32>
    %cst_94 = arith.constant dense<0xFF800000> : vector<8xf32>
    %330 = vector.multi_reduction <maximumf>, %329, %cst_94 [1] : vector<8x8xf32> to vector<8xf32>
    %331 = vector.shape_cast %330 : vector<8xf32> to vector<8x1xf32>
    %332 = vector.broadcast %331 : vector<8x1xf32> to vector<8x8xf32>
    %333 = arith.subf %329, %332 : vector<8x8xf32>
    %334 = math.exp %333 : vector<8x8xf32>
    %cst_95 = arith.constant dense<0.000000e+00> : vector<8xf32>
    %335 = vector.multi_reduction <add>, %334, %cst_95 [1] : vector<8x8xf32> to vector<8xf32>
    %336 = vector.shape_cast %335 : vector<8xf32> to vector<8x1xf32>
    %337 = vector.broadcast %336 : vector<8x1xf32> to vector<8x8xf32>
    %338 = arith.divf %334, %337 : vector<8x8xf32>
    %cst_96 = arith.constant dense<0.000000e+00> : vector<8x8xf32>
    %339 = tpu.matmul %338, %328, %cst_96 {dimension_numbers = #tpu.dot_dimension_numbers<[1], [0], [0], [1], [0, 0, 1, 1], [], []>} : vector<8x8xf32>, vector<8x8xf32>, vector<8x8xf32> -> vector<8x8xf32>
    %340 = vector.extract_strided_slice %295 {offsets = [0, 24], sizes = [8, 8], strides = [1, 1]} : vector<8x32xf32> to vector<8x8xf32>
    %341 = vector.extract_strided_slice %296 {offsets = [0, 24], sizes = [8, 8], strides = [1, 1]} : vector<8x32xf32> to vector<8x8xf32>
    %342 = vector.extract_strided_slice %297 {offsets = [0, 24], sizes = [8, 8], strides = [1, 1]} : vector<8x32xf32> to vector<8x8xf32>
    %cst_97 = arith.constant dense<0.000000e+00> : vector<8x8xf32>
    %343 = tpu.matmul %340, %341, %cst_97 {dimension_numbers = #tpu.dot_dimension_numbers<[1], [1], [0], [0], [0, 0, 1, 0], [], []>} : vector<8x8xf32>, vector<8x8xf32>, vector<8x8xf32> -> vector<8x8xf32>
    %cst_98 = arith.constant dense<0xFF800000> : vector<8xf32>
    %344 = vector.multi_reduction <maximumf>, %343, %cst_98 [1] : vector<8x8xf32> to vector<8xf32>
    %345 = vector.shape_cast %344 : vector<8xf32> to vector<8x1xf32>
    %346 = vector.broadcast %345 : vector<8x1xf32> to vector<8x8xf32>
    %347 = arith.subf %343, %346 : vector<8x8xf32>
    %348 = math.exp %347 : vector<8x8xf32>
    %cst_99 = arith.constant dense<0.000000e+00> : vector<8xf32>
    %349 = vector.multi_reduction <add>, %348, %cst_99 [1] : vector<8x8xf32> to vector<8xf32>
    %350 = vector.shape_cast %349 : vector<8xf32> to vector<8x1xf32>
    %351 = vector.broadcast %350 : vector<8x1xf32> to vector<8x8xf32>
    %352 = arith.divf %348, %351 : vector<8x8xf32>
    %cst_100 = arith.constant dense<0.000000e+00> : vector<8x8xf32>
    %353 = tpu.matmul %352, %342, %cst_100 {dimension_numbers = #tpu.dot_dimension_numbers<[1], [0], [0], [1], [0, 0, 1, 1], [], []>} : vector<8x8xf32>, vector<8x8xf32>, vector<8x8xf32> -> vector<8x8xf32>
    %354 = tpu.concatenate %311, %325, %339, %353 in 1 : vector<8x8xf32>, vector<8x8xf32>, vector<8x8xf32>, vector<8x8xf32> -> vector<8x32xf32>
    %cst_101 = arith.constant dense<0.000000e+00> : vector<8x32xf32>
    %355 = tpu.matmul %354, %7, %cst_101 {dimension_numbers = #tpu.dot_dimension_numbers<[1], [0], [0], [1], [0, 0, 1, 1], [], []>} : vector<8x32xf32>, vector<32x32xf32>, vector<8x32xf32> -> vector<8x32xf32>
    %356 = tpu.concatenate %294, %355 in 1 : vector<8x32xf32>, vector<8x32xf32> -> vector<8x64xf32>
    %cst_102 = arith.constant dense<0.000000e+00> : vector<8x32xf32>
    %357 = tpu.matmul %356, %9, %cst_102 {dimension_numbers = #tpu.dot_dimension_numbers<[1], [0], [0], [1], [0, 0, 1, 1], [], []>} : vector<8x64xf32>, vector<64x32xf32>, vector<8x32xf32> -> vector<8x32xf32>
    %358 = vector.broadcast %15 : vector<1x32xf32> to vector<8x32xf32>
    %359 = arith.addf %357, %358 : vector<8x32xf32>
    %360 = arith.negf %359 : vector<8x32xf32>
    %361 = math.exp %360 : vector<8x32xf32>
    %cst_103 = arith.constant 1.000000e+00 : f32
    %362 = vector.broadcast %cst_103 : f32 to vector<8x32xf32>
    %363 = arith.addf %362, %361 : vector<8x32xf32>
    %364 = arith.divf %362, %363 : vector<8x32xf32>
    %365 = arith.mulf %364, %294 : vector<8x32xf32>
    %cst_104 = arith.constant 1.000000e+00 : f32
    %366 = vector.broadcast %cst_104 : f32 to vector<8x32xf32>
    %367 = arith.subf %366, %364 : vector<8x32xf32>
    %368 = arith.mulf %367, %355 : vector<8x32xf32>
    %369 = arith.addf %365, %368 : vector<8x32xf32>
    %370 = vector.extract_strided_slice %4 {offsets = [2, 0], sizes = [1, 32], strides = [1, 1]} : vector<4x32xf32> to vector<1x32xf32>
    %371 = vector.broadcast %370 : vector<1x32xf32> to vector<8x32xf32>
    %372 = arith.mulf %264, %371 : vector<8x32xf32>
    %373 = vector.extract_strided_slice %4 {offsets = [3, 0], sizes = [1, 32], strides = [1, 1]} : vector<4x32xf32> to vector<1x32xf32>
    %374 = vector.broadcast %373 : vector<1x32xf32> to vector<8x32xf32>
    %375 = arith.addf %372, %374 : vector<8x32xf32>
    %376 = vector.extract_strided_slice %285 {offsets = [0, 32], sizes = [8, 32], strides = [1, 1]} : vector<8x128xf32> to vector<8x32xf32>
    %377 = vector.extract_strided_slice %285 {offsets = [0, 64], sizes = [8, 32], strides = [1, 1]} : vector<8x128xf32> to vector<8x32xf32>
    %378 = vector.extract_strided_slice %285 {offsets = [0, 96], sizes = [8, 32], strides = [1, 1]} : vector<8x128xf32> to vector<8x32xf32>
    %379 = vector.extract_strided_slice %376 {offsets = [0, 0], sizes = [8, 8], strides = [1, 1]} : vector<8x32xf32> to vector<8x8xf32>
    %380 = vector.extract_strided_slice %377 {offsets = [0, 0], sizes = [8, 8], strides = [1, 1]} : vector<8x32xf32> to vector<8x8xf32>
    %381 = vector.extract_strided_slice %378 {offsets = [0, 0], sizes = [8, 8], strides = [1, 1]} : vector<8x32xf32> to vector<8x8xf32>
    %cst_105 = arith.constant dense<0.000000e+00> : vector<8x8xf32>
    %382 = tpu.matmul %379, %380, %cst_105 {dimension_numbers = #tpu.dot_dimension_numbers<[1], [1], [0], [0], [0, 0, 1, 0], [], []>} : vector<8x8xf32>, vector<8x8xf32>, vector<8x8xf32> -> vector<8x8xf32>
    %cst_106 = arith.constant dense<0xFF800000> : vector<8xf32>
    %383 = vector.multi_reduction <maximumf>, %382, %cst_106 [1] : vector<8x8xf32> to vector<8xf32>
    %384 = vector.shape_cast %383 : vector<8xf32> to vector<8x1xf32>
    %385 = vector.broadcast %384 : vector<8x1xf32> to vector<8x8xf32>
    %386 = arith.subf %382, %385 : vector<8x8xf32>
    %387 = math.exp %386 : vector<8x8xf32>
    %cst_107 = arith.constant dense<0.000000e+00> : vector<8xf32>
    %388 = vector.multi_reduction <add>, %387, %cst_107 [1] : vector<8x8xf32> to vector<8xf32>
    %389 = vector.shape_cast %388 : vector<8xf32> to vector<8x1xf32>
    %390 = vector.broadcast %389 : vector<8x1xf32> to vector<8x8xf32>
    %391 = arith.divf %387, %390 : vector<8x8xf32>
    %cst_108 = arith.constant dense<0.000000e+00> : vector<8x8xf32>
    %392 = tpu.matmul %391, %381, %cst_108 {dimension_numbers = #tpu.dot_dimension_numbers<[1], [0], [0], [1], [0, 0, 1, 1], [], []>} : vector<8x8xf32>, vector<8x8xf32>, vector<8x8xf32> -> vector<8x8xf32>
    %393 = vector.extract_strided_slice %376 {offsets = [0, 8], sizes = [8, 8], strides = [1, 1]} : vector<8x32xf32> to vector<8x8xf32>
    %394 = vector.extract_strided_slice %377 {offsets = [0, 8], sizes = [8, 8], strides = [1, 1]} : vector<8x32xf32> to vector<8x8xf32>
    %395 = vector.extract_strided_slice %378 {offsets = [0, 8], sizes = [8, 8], strides = [1, 1]} : vector<8x32xf32> to vector<8x8xf32>
    %cst_109 = arith.constant dense<0.000000e+00> : vector<8x8xf32>
    %396 = tpu.matmul %393, %394, %cst_109 {dimension_numbers = #tpu.dot_dimension_numbers<[1], [1], [0], [0], [0, 0, 1, 0], [], []>} : vector<8x8xf32>, vector<8x8xf32>, vector<8x8xf32> -> vector<8x8xf32>
    %cst_110 = arith.constant dense<0xFF800000> : vector<8xf32>
    %397 = vector.multi_reduction <maximumf>, %396, %cst_110 [1] : vector<8x8xf32> to vector<8xf32>
    %398 = vector.shape_cast %397 : vector<8xf32> to vector<8x1xf32>
    %399 = vector.broadcast %398 : vector<8x1xf32> to vector<8x8xf32>
    %400 = arith.subf %396, %399 : vector<8x8xf32>
    %401 = math.exp %400 : vector<8x8xf32>
    %cst_111 = arith.constant dense<0.000000e+00> : vector<8xf32>
    %402 = vector.multi_reduction <add>, %401, %cst_111 [1] : vector<8x8xf32> to vector<8xf32>
    %403 = vector.shape_cast %402 : vector<8xf32> to vector<8x1xf32>
    %404 = vector.broadcast %403 : vector<8x1xf32> to vector<8x8xf32>
    %405 = arith.divf %401, %404 : vector<8x8xf32>
    %cst_112 = arith.constant dense<0.000000e+00> : vector<8x8xf32>
    %406 = tpu.matmul %405, %395, %cst_112 {dimension_numbers = #tpu.dot_dimension_numbers<[1], [0], [0], [1], [0, 0, 1, 1], [], []>} : vector<8x8xf32>, vector<8x8xf32>, vector<8x8xf32> -> vector<8x8xf32>
    %407 = vector.extract_strided_slice %376 {offsets = [0, 16], sizes = [8, 8], strides = [1, 1]} : vector<8x32xf32> to vector<8x8xf32>
    %408 = vector.extract_strided_slice %377 {offsets = [0, 16], sizes = [8, 8], strides = [1, 1]} : vector<8x32xf32> to vector<8x8xf32>
    %409 = vector.extract_strided_slice %378 {offsets = [0, 16], sizes = [8, 8], strides = [1, 1]} : vector<8x32xf32> to vector<8x8xf32>
    %cst_113 = arith.constant dense<0.000000e+00> : vector<8x8xf32>
    %410 = tpu.matmul %407, %408, %cst_113 {dimension_numbers = #tpu.dot_dimension_numbers<[1], [1], [0], [0], [0, 0, 1, 0], [], []>} : vector<8x8xf32>, vector<8x8xf32>, vector<8x8xf32> -> vector<8x8xf32>
    %cst_114 = arith.constant dense<0xFF800000> : vector<8xf32>
    %411 = vector.multi_reduction <maximumf>, %410, %cst_114 [1] : vector<8x8xf32> to vector<8xf32>
    %412 = vector.shape_cast %411 : vector<8xf32> to vector<8x1xf32>
    %413 = vector.broadcast %412 : vector<8x1xf32> to vector<8x8xf32>
    %414 = arith.subf %410, %413 : vector<8x8xf32>
    %415 = math.exp %414 : vector<8x8xf32>
    %cst_115 = arith.constant dense<0.000000e+00> : vector<8xf32>
    %416 = vector.multi_reduction <add>, %415, %cst_115 [1] : vector<8x8xf32> to vector<8xf32>
    %417 = vector.shape_cast %416 : vector<8xf32> to vector<8x1xf32>
    %418 = vector.broadcast %417 : vector<8x1xf32> to vector<8x8xf32>
    %419 = arith.divf %415, %418 : vector<8x8xf32>
    %cst_116 = arith.constant dense<0.000000e+00> : vector<8x8xf32>
    %420 = tpu.matmul %419, %409, %cst_116 {dimension_numbers = #tpu.dot_dimension_numbers<[1], [0], [0], [1], [0, 0, 1, 1], [], []>} : vector<8x8xf32>, vector<8x8xf32>, vector<8x8xf32> -> vector<8x8xf32>
    %421 = vector.extract_strided_slice %376 {offsets = [0, 24], sizes = [8, 8], strides = [1, 1]} : vector<8x32xf32> to vector<8x8xf32>
    %422 = vector.extract_strided_slice %377 {offsets = [0, 24], sizes = [8, 8], strides = [1, 1]} : vector<8x32xf32> to vector<8x8xf32>
    %423 = vector.extract_strided_slice %378 {offsets = [0, 24], sizes = [8, 8], strides = [1, 1]} : vector<8x32xf32> to vector<8x8xf32>
    %cst_117 = arith.constant dense<0.000000e+00> : vector<8x8xf32>
    %424 = tpu.matmul %421, %422, %cst_117 {dimension_numbers = #tpu.dot_dimension_numbers<[1], [1], [0], [0], [0, 0, 1, 0], [], []>} : vector<8x8xf32>, vector<8x8xf32>, vector<8x8xf32> -> vector<8x8xf32>
    %cst_118 = arith.constant dense<0xFF800000> : vector<8xf32>
    %425 = vector.multi_reduction <maximumf>, %424, %cst_118 [1] : vector<8x8xf32> to vector<8xf32>
    %426 = vector.shape_cast %425 : vector<8xf32> to vector<8x1xf32>
    %427 = vector.broadcast %426 : vector<8x1xf32> to vector<8x8xf32>
    %428 = arith.subf %424, %427 : vector<8x8xf32>
    %429 = math.exp %428 : vector<8x8xf32>
    %cst_119 = arith.constant dense<0.000000e+00> : vector<8xf32>
    %430 = vector.multi_reduction <add>, %429, %cst_119 [1] : vector<8x8xf32> to vector<8xf32>
    %431 = vector.shape_cast %430 : vector<8xf32> to vector<8x1xf32>
    %432 = vector.broadcast %431 : vector<8x1xf32> to vector<8x8xf32>
    %433 = arith.divf %429, %432 : vector<8x8xf32>
    %cst_120 = arith.constant dense<0.000000e+00> : vector<8x8xf32>
    %434 = tpu.matmul %433, %423, %cst_120 {dimension_numbers = #tpu.dot_dimension_numbers<[1], [0], [0], [1], [0, 0, 1, 1], [], []>} : vector<8x8xf32>, vector<8x8xf32>, vector<8x8xf32> -> vector<8x8xf32>
    %435 = tpu.concatenate %392, %406, %420, %434 in 1 : vector<8x8xf32>, vector<8x8xf32>, vector<8x8xf32>, vector<8x8xf32> -> vector<8x32xf32>
    %cst_121 = arith.constant dense<0.000000e+00> : vector<8x32xf32>
    %436 = tpu.matmul %435, %8, %cst_121 {dimension_numbers = #tpu.dot_dimension_numbers<[1], [0], [0], [1], [0, 0, 1, 1], [], []>} : vector<8x32xf32>, vector<32x32xf32>, vector<8x32xf32> -> vector<8x32xf32>
    %437 = tpu.concatenate %375, %436 in 1 : vector<8x32xf32>, vector<8x32xf32> -> vector<8x64xf32>
    %cst_122 = arith.constant dense<0.000000e+00> : vector<8x32xf32>
    %438 = tpu.matmul %437, %10, %cst_122 {dimension_numbers = #tpu.dot_dimension_numbers<[1], [0], [0], [1], [0, 0, 1, 1], [], []>} : vector<8x64xf32>, vector<64x32xf32>, vector<8x32xf32> -> vector<8x32xf32>
    %439 = vector.broadcast %16 : vector<1x32xf32> to vector<8x32xf32>
    %440 = arith.addf %438, %439 : vector<8x32xf32>
    %441 = arith.negf %440 : vector<8x32xf32>
    %442 = math.exp %441 : vector<8x32xf32>
    %cst_123 = arith.constant 1.000000e+00 : f32
    %443 = vector.broadcast %cst_123 : f32 to vector<8x32xf32>
    %444 = arith.addf %443, %442 : vector<8x32xf32>
    %445 = arith.divf %443, %444 : vector<8x32xf32>
    %446 = arith.mulf %445, %375 : vector<8x32xf32>
    %cst_124 = arith.constant 1.000000e+00 : f32
    %447 = vector.broadcast %cst_124 : f32 to vector<8x32xf32>
    %448 = arith.subf %447, %445 : vector<8x32xf32>
    %449 = arith.mulf %448, %436 : vector<8x32xf32>
    %450 = arith.addf %446, %449 : vector<8x32xf32>
    %451 = tpu.concatenate %243, %246, %369, %450 in 1 : vector<8x32xf32>, vector<8x32xf32>, vector<8x32xf32>, vector<8x32xf32> -> vector<8x128xf32>
    %c1 = arith.constant 1 : index
    %c0_125 = arith.constant 0 : index
    %c0_126 = arith.constant 0 : index
    %452 = vector.load %arg7[%c1, %c0_125, %c0_126] : memref<2x8x128xf32, #tpu.memory_space<vmem>>, vector<1x8x128xf32>
    %453 = vector.shape_cast %452 : vector<1x8x128xf32> to vector<8x128xf32>
    %454 = vector.shape_cast %451 : vector<8x128xf32> to vector<1x8x128xf32>
    tpu.vector_store %arg7[%c1, %c0_125, %c0_126], %454 {strides = array<i32>} : memref<2x8x128xf32, #tpu.memory_space<vmem>>, vector<1x8x128xf32>,
    return
  }
}

</mosaic_0001>

<bundles_post_ra>
// kernel: tpu_custom_call.1
= control target key start
LH: loop header
LB: loop body
LE: loop exit
PB: predicated region body
PF: predicated region fallthrough
CT: control target
= control target key end

     0   :  { %vm77_vm0 = vcmask 261120   ;;  %s5835_s0 = inlined_call_operand.vmem [shape: f32[2,8,32], index: 0, kind: input, shape index: {}]   ;;  %s5836_s1 = inlined_call_operand.vmem [shape: f32[2,8,32], index: 1, kind: input, shape index: {}]   ;;  %s5837_s2 = inlined_call_operand.vmem [shape: f32[32,128], index: 2, kind: input, shape index: {}]   ;;  %s5838_s3 = inlined_call_operand.vmem [shape: f32[32,64], index: 3, kind: input, shape index: {}]   ;;  %s5839_s4 = inlined_call_operand.vmem [shape: f32[256,32], index: 4, kind: input, shape index: {}]   ;;  %s5840_s5 = inlined_call_operand.vmem [shape: f32[3,128], index: 5, kind: input, shape index: {}]   ;;  %s5841_s6 = inlined_call_operand.vmem [shape: f32[4,32], index: 6, kind: input, shape index: {}]   ;;  %s5842_s7 = inlined_call_operand.hbm [shape: f32[2,8,128], index: 7, kind: output, shape index: {}]  }
   0x1   :  { %v69_v0 = vld [vmem:[%s5835_s0] sm:$0xff] }
   0x2   :  { %v71_v1 = vld [vmem:[%s5836_s1] sm:$0xff] }
   0x3   :  { %12 = vsyncpa [#allocation3], 0  ;;  %v242_v2 = vsel %vm77_vm0, %v69_v0, 0.0  ;;  %v228_v3 = vsel %vm77_vm0, %v71_v1, 0.0  ;;  %v4877_v14 = vmov 0.0   ;;  %v4958_v15 = vld [vmem:[%s5839_s4 + $0x38] sm:$0xff]  ;;  %v73_v27 = vlaneseq }
   0x4   :  { %243 = vadd.xlane.f32.xlu0 %v242_v2  ;;  %4390 = vmatprep.subr.mxu1 %v4877_v14  ;;  %v4966_v16 = vld [vmem:[%s5839_s4 + $0x30] sm:$0xff]  ;;  %v4972_v17 = vld [vmem:[%s5839_s4 + $0x18] sm:$0xff]  ;;  %v4979_v18 = vld [vmem:[%s5839_s4 + $0x28] sm:$0xff]  ;;  %vm4878_vm1 = vmmov 0   ;;  %vm419_vm2 = vcmask 64512   ;;  %s4879_s15 = smov 120  }
   0x5   :  { %4379 = vmatprep.subr.mxu0 %v4877_v14  ;;  %4391 = vmatpush3.msra.mxu1 %v4958_v15  ;;  %v4984_v19 = vld [vmem:[%s5839_s4 + $0x10] sm:$0xff]  ;;  %v4989_v20 = vld [vmem:[%s5839_s4 + $0x20] sm:$0xff]  ;;  %v4998_v21 = vld [vmem:[%s5839_s4 + $0x8] sm:$0xff]  ;;  %v5053_v30 = vshrl.u32 %v73_v27, 7  ;;  %s4880_s16 = smov 96   ;;  %s4881_s17 = smov 112  }
   0x6   :  { %4392 = vmatprep.subr.mxu1 %v4877_v14  ;;  %4380 = vmatpush3.msra.mxu0 %v4972_v17  ;;  %v5006_v22 = vld [vmem:[%s5838_s3 + $0x18] sm:$0xff]  ;;  %v5013_v23 = vld [vmem:[%s5839_s4] sm:$0xff]  ;;  %v5022_v24 = vld [vmem:[%s5838_s3 + $0x10] sm:$0xff]  ;;  %s4882_s18 = smov 104   ;;  %s4883_s19 = smov 88   ;;  %vm1091_vm3 = vcmask 130048  }
   0x7   :  { %4393 = vmatpush3.msra.mxu1 %v4966_v16  ;;  %4381 = vmatprep.subr.mxu0 %v4877_v14  ;;  %v5030_v25 = vld [vmem:[%s5837_s2 + $0x18] sm:$0xff]  ;;  %v5037_v26 = vld [vmem:[%s5838_s3 + $0x8] sm:$0xff]  ;;  %v5044_v28 = vld [vmem:[%s5837_s2 + $0x10] sm:$0xff]  ;;  %v75_v32 = vsub.s32 2, %v5053_v30  ;;  %v1267_v36 = vsub.s32 3, %v5053_v30  ;;  %v334_v52 = vsub.s32 1, %v5053_v30 }
   0x8   :  { %229 = vadd.xlane.f32.xlu0 %v228_v3  ;;  %4394 = vmatprep.subr.mxu1 %v4877_v14  ;;  %v5051_v29 = vld [vmem:[%s5838_s3] sm:$0xff]  ;;  %v5062_v31 = vld [vmem:[%s5837_s2 + $0x8] sm:$0xff]  ;;  %v257_v55 = vsub.s32 0, %v5053_v30  ;;  %s4884_s20 = smov 72   ;;  %s4885_s21 = smov 80   ;;  %vm1093_vm4 = vcmask 195584  }
   0x9   :  { %4395 = vmatpush3.msra.mxu1 %v4979_v18  ;;  %4382 = vmatpush3.msra.mxu0 %v4984_v19  ;;  %v5071_v33 = vld [vmem:[%s5841_s6] sm:$0xf]  ;;  %s4886_s30 = smov 8   ;;  %s4887_s8 = smov 16   ;;  %vm1176_vm5 = vcmask 523264   ;;  %vm2123_vm6 = vcmask 785408  }
   0xa   :  { %4396 = vmatprep.subr.mxu1 %v4877_v14  ;;  %4398 = vmatprep.mubr.msk.f32.mxu1 %vm4878_vm1, %v4877_v14  ;;  %v5077_v34 = vld [vmem:[%s5837_s2] sm:$0xff]  ;;  %v5086_v35 = vrot.slane %v5071_v33, %v75_v32  ;;  %v5092_v37 = vrot.slane %v5071_v33, %v1267_v36  ;;  %s4888_s9 = smov 64   ;;  %s4889_s10 = smov 24  }
   0xb   :  { %4397 = vmatpush3.msra.mxu1 %v4989_v20  ;;  %4383 = vmatprep.subr.mxu0 %v4877_v14  ;;  %v67_v53 = vld [vmem:[%s5840_s5] sm:$0x7]  ;;  %s4890_s11 = smov 56   ;;  %s4891_s3 = smov 32  }
   0xc   :  { %4399 = vmatmul.mubr.msk.f32.vlgmr.msra.gmra.mxu1 %vm77_vm0, %v71_v1  ;;  %4384 = vmatpush3.msra.mxu0 %v4998_v21  ;;  %v5116_v54 = vrot.slane %v67_v53, %v334_v52  ;;  %v5124_v58 = vrot.slane %v67_v53, %v257_v55  ;;  %s4892_s12 = smov 48   ;;  %s4893_s13 = smov 40  }
   0xd   :  { %4412 = vmatprep.subr.mxu1 %v4877_v14  ;;  %4385 = vmatprep.subr.mxu0 %v4877_v14 }
   0xe   :  { %4413 = vmatpush3.msra.mxu1 %v5006_v22  ;;  %4386 = vmatpush3.msra.mxu0 %v5013_v23 }
   0xf   :  { %4387 = vmatprep.mubr.msk.f32.mxu0 %vm4878_vm1, %v4877_v14  ;;  %4414 = vmatprep.subr.mxu1 %v4877_v14 }
  0x10   :  { %4388 = vmatmul.mubr.msk.f32.vlgmr.msra.gmra.mxu0 %vm77_vm0, %v69_v0  ;;  %4415 = vmatpush3.msra.mxu1 %v5022_v24 }
  0x11   :  { %4401 = vmatprep.subr.mxu0 %v4877_v14  ;;  %4416 = vmatprep.subr.mxu1 %v4877_v14 }
  0x12   :  { %4402 = vmatpush3.msra.mxu0 %v5030_v25  ;;  %4417 = vmatpush3.msra.mxu1 %v5037_v26 }
  0x13   :  { %4403 = vmatprep.subr.mxu0 %v4877_v14  ;;  %4418 = vmatprep.subr.mxu1 %v4877_v14 }
  0x14   :  { %4404 = vmatpush3.msra.mxu0 %v5044_v28  ;;  %4419 = vmatpush3.msra.mxu1 %v5051_v29 }
  0x15   :  { %4420 = vmatprep.mubr.msk.f32.mxu1 %vm4878_vm1, %v4877_v14  ;;  %4405 = vmatprep.subr.mxu0 %v4877_v14 }
  0x16   :  { %4409 = vmatprep.mubr.msk.f32.mxu0 %vm4878_vm1, %v4877_v14  ;;  %4406 = vmatpush3.msra.mxu0 %v5062_v31 }
  0x17   :  { %4438 = vmatprep.subr.mxu1 %v4877_v14  ;;  %4407 = vmatprep.subr.mxu0 %v4877_v14 }
  0x18   :  { %4408 = vmatpush3.msra.mxu0 %v5077_v34 }
  0x19   :  { %4423 = vmatprep.subr.mxu0 %v4877_v14 }
  0x8d   :  { %v244_v4 = vpop.xlane.xlu0 %243 }
  0x8e   :  { %v245_v5 = vmul.f32 0.03125, %v244_v4 }
  0x90   :  { %v4944_v6 = vsub.f32 %v69_v0, %v245_v5 }
  0x91   :  { %v230_v7 = vpop.xlane.xlu0 %229 }
  0x92   :  { %v232_v8 = vmul.f32 0.03125, %v230_v7  ;;  %v247_v9 = vmul.f32 %v4944_v6, %v4944_v6 }
  0x94   :  { %v4948_v10 = vsub.f32 %v71_v1, %v232_v8  ;;  %v248_v11 = vsel %vm77_vm0, %v247_v9, 0.0 }
  0x95   :  { %249 = vadd.xlane.f32.xlu1 %v248_v11 }
  0x96   :  { %v234_v12 = vmul.f32 %v4948_v10, %v4948_v10 }
  0x98   :  { %v235_v13 = vsel %vm77_vm0, %v234_v12, 0.0 }
  0x99   :  { %236 = vadd.xlane.f32.xlu1 %v235_v13 }
  0xcc   :  { %v5106_v48 = vpop.f32.mrf.mxu1 }
  0xce   :  { %v4400_v49 = vpop.f32.mrf.mxu1 }
  0xd0   :  { %v5108_v50 = vpop.f32.mrf.mxu0 }
  0xd2   :  { %v4389_v51 = vpop.f32.mrf.mxu0 }
 0x11e   :  { %v250_v38 = vpop.xlane.xlu1 %249 }
 0x11f   :  { %v251_v39 = vmul.f32 0.03125, %v250_v38 }
 0x121   :  { %v252_v40 = vadd.f32 1e-05, %v251_v39 }
 0x122   :  { %v237_v41 = vpop.xlane.xlu1 %236 }
 0x123   :  { %4766 = vrsqrt.f32 %v252_v40  ;;  %v238_v42 = vmul.f32 0.03125, %v237_v41 }
 0x125   :  { %v239_v43 = vadd.f32 1e-05, %v238_v42 }
 0x127   :  { %4768 = vrsqrt.f32 %v239_v43 }
 0x130   :  { %v4767_v44 = vpop.eup %4766 }
 0x131   :  { %v254_v45 = vmul.f32 %v4767_v44, %v4944_v6 }
 0x133   :  { %4421 = vmatmul.mubr.msk.f32.vlgmr.msra.gmra.mxu1 %vm77_vm0, %v254_v45 }
 0x134   :  { %v4769_v46 = vpop.eup %4768  ;;  %4440 = vmatprep.mubr.msk.f32.mxu1 %vm4878_vm1, %v4877_v14 }
 0x135   :  { %v5100_v47 = vmul.f32 %v4769_v46, %v4948_v10 }
 0x137   :  { %4410 = vmatmul.mubr.msk.f32.vlgmr.msra.gmra.mxu0 %vm77_vm0, %v5100_v47 }
 0x138   :  { %4425 = vmatprep.mubr.msk.f32.mxu0 %vm4878_vm1, %v4877_v14 }
 0x1f3   :  { %v405_v56 = vpop.f32.mrf.mxu1 }
 0x1f4   :  { %v5120_v57 = vadd.f32 %v405_v56, %v5116_v54 }
 0x1f5   :  { %v4422_v59 = vpop.f32.mrf.mxu1 }
 0x1f6   :  { %585 = vrot.lane.b32.xlu1 %v5120_v57, %s4879_s15  ;;  %4424 = vmatpush3.xpose.msk.msra.mxu0 %vm419_vm2, %v5120_v57 }
 0x1f7   :  { %v328_v60 = vpop.f32.mrf.mxu0  ;;  %4428 = vmatprep.subr.mxu0 %v4877_v14 }
 0x1f8   :  { %v5132_v61 = vadd.f32 %v328_v60, %v5124_v58 }
 0x1f9   :  { %v4411_v62 = vpop.f32.mrf.mxu0 }
 0x1fa   :  { %583 = vrot.lane.b32.xlu1 %v5132_v61, %s4879_s15  ;;  %4426 = vmatmul.mubr.msk.f32.vlgmr.msra.gmra.mxu0 %vm419_vm2, %v5132_v61 }
 0x1fb   :  { %4430 = vmatprep.mubr.msk.f32.mxu0 %vm4878_vm1, %v4877_v14 }
 0x268   :  { %v586_v8 = vpop.permute.xlu1 %585 }
 0x26c   :  { %v584_v9 = vpop.permute.xlu1 %583 }
 0x2ba   :  { %v492_v63 = vpop.f32.mrf.mxu0 }
 0x2bb   :  { %v496_v0 = vsel %vm419_vm2, %v492_v63, -inf }
 0x2bc   :  { %497 = vmax.xlane.f32.xlu0 %v496_v0  ;;  %v4427_v1 = vpop.f32.mrf.mxu0 }
 0x2d2   :  { %507 = vrot.lane.b32.xlu0 %v5120_v57, %s4880_s16 }
 0x2d6   :  { %748 = vrot.lane.b32.xlu0 %v5132_v61, %s4881_s17 }
 0x2da   :  { %913 = vrot.lane.b32.xlu0 %v5132_v61, %s4882_s18 }
 0x345   :  { %v498_v2 = vpop.xlane.xlu0 %497 }
 0x346   :  { %v499_v3 = vsub.f32 %v492_v63, %v498_v2 }
 0x348   :  { %v500_v4 = vmul.f32 1.442695, %v499_v3 }
 0x349   :  { %v508_v5 = vpop.permute.xlu0 %507 }
 0x34a   :  { %4770 = vpow2.f32 %v500_v4  ;;  %4429 = vmatpush3.msra.mxu0 %v508_v5 }
 0x34b   :  { %4433 = vmatprep.subr.mxu0 %v4877_v14 }
 0x34d   :  { %v749_v27 = vpop.permute.xlu0 %748 }
 0x351   :  { %v914_v38 = vpop.permute.xlu0 %913 }
 0x357   :  { %v4771_v6 = vpop.eup %4770 }
 0x358   :  { %v502_v7 = vsel %vm419_vm2, %v4771_v6, 0.0 }
 0x359   :  { %503 = vadd.xlane.f32.xlu1 %v502_v7 }
 0x36a   :  { %750 = vrot.lane.b32.xlu1 %v5120_v57, %s4881_s17 }
 0x36e   :  { %915 = vrot.lane.b32.xlu1 %v5120_v57, %s4882_s18 }
 0x3e2   :  { %v504_v10 = vpop.xlane.xlu1 %503 }
 0x3e3   :  { %4772 = vrcp.f32 %v504_v10 }
 0x3e6   :  { %v751_v13 = vpop.permute.xlu1 %750 }
 0x3ea   :  { %v916_v36 = vpop.permute.xlu1 %915 }
 0x3f0   :  { %v4773_v11 = vpop.eup %4772 }
 0x3f1   :  { %v506_v12 = vmul.f32 %v4773_v11, %v4771_v6 }
 0x3f3   :  { %4431 = vmatmul.mubr.msk.f32.vlgmr.msra.gmra.mxu0 %vm419_vm2, %v506_v12 }
 0x3f4   :  { %4434 = vmatpush3.xpose.msk.msra.mxu0 %vm419_vm2, %v586_v8  ;;  %4435 = vmatprep.mubr.msk.f32.mxu0 %vm4878_vm1, %v4877_v14 }
 0x3f5   :  { %4443 = vmatprep.subr.mxu0 %v4877_v14 }
 0x3f7   :  { %4436 = vmatmul.mubr.msk.f32.vlgmr.msra.gmra.mxu0 %vm419_vm2, %v584_v9 }
 0x3f8   :  { %4444 = vmatpush3.xpose.msk.msra.mxu0 %vm419_vm2, %v751_v13  ;;  %4445 = vmatprep.mubr.msk.f32.mxu0 %vm4878_vm1, %v4877_v14 }
 0x3f9   :  { %4453 = vmatprep.subr.mxu0 %v4877_v14 }
 0x3fb   :  { %4446 = vmatmul.mubr.msk.f32.vlgmr.msra.gmra.mxu0 %vm419_vm2, %v749_v27 }
 0x3fc   :  { %4454 = vmatpush3.xpose.msk.msra.mxu0 %vm419_vm2, %v916_v36  ;;  %4455 = vmatprep.mubr.msk.f32.mxu0 %vm4878_vm1, %v4877_v14 }
 0x3fd   :  { %4463 = vmatprep.subr.mxu0 %v4877_v14 }
 0x3ff   :  { %4456 = vmatmul.mubr.msk.f32.vlgmr.msra.gmra.mxu0 %vm419_vm2, %v914_v38 }
 0x400   :  { %4471 = vmatprep.mubr.msk.f32.mxu0 %vm4878_vm1, %v4877_v14 }
 0x4b3   :  { %v5171_v39 = vpop.f32.mrf.mxu0 }
 0x4b5   :  { %v4432_v40 = vpop.f32.mrf.mxu0 }
 0x4b7   :  { %v657_v41 = vpop.f32.mrf.mxu0 }
 0x4b8   :  { %v661_v42 = vsel %vm419_vm2, %v657_v41, -inf }
 0x4b9   :  { %662 = vmax.xlane.f32.xlu1 %v661_v42  ;;  %v4437_v43 = vpop.f32.mrf.mxu0 }
 0x4bb   :  { %v822_v44 = vpop.f32.mrf.mxu0 }
 0x4bc   :  { %v826_v45 = vsel %vm419_vm2, %v822_v44, -inf }
 0x4bd   :  { %827 = vmax.xlane.f32.xlu0 %v826_v45  ;;  %v4447_v46 = vpop.f32.mrf.mxu0  ;;  %v5205_v45 = vld [vmem:[%s5839_s4 + $0x50] sm:$0xff] }
 0x4be   :  { %v5214_v46 = vld [vmem:[%s5839_s4 + $0x48] sm:$0xff] }
 0x4bf   :  { %v987_v49 = vpop.f32.mrf.mxu0 }
 0x4c0   :  { %v991_v51 = vsel %vm419_vm2, %v987_v49, -inf }
 0x4c1   :  { %992 = vmax.xlane.f32.xlu0 %v991_v51  ;;  %v4457_v53 = vpop.f32.mrf.mxu0 }
 0x4ca   :  { %672 = vrot.lane.b32.xlu1 %v5120_v57, %s4883_s19 }
 0x542   :  { %v663_v56 = vpop.xlane.xlu1 %662 }
 0x543   :  { %v664_v59 = vsub.f32 %v657_v41, %v663_v56 }
 0x545   :  { %v665_v60 = vmul.f32 1.442695, %v664_v59 }
 0x546   :  { %v673_v62 = vpop.permute.xlu1 %672  ;;  %v828_v63 = vpop.xlane.xlu0 %827 }
 0x547   :  { %4774 = vpow2.f32 %v665_v60  ;;  %v829_v0 = vsub.f32 %v822_v44, %v828_v63  ;;  %4439 = vmatpush3.msra.mxu1 %v673_v62  ;;  %v5200_v44 = vld [vmem:[%s5839_s4 + $0x58] sm:$0xff] }
 0x548   :  { %4448 = vmatprep.subr.mxu1 %v4877_v14  ;;  %4464 = vmatpush3.msra.mxu0 %v5200_v44 }
 0x549   :  { %v830_v1 = vmul.f32 1.442695, %v829_v0  ;;  %4465 = vmatprep.subr.mxu0 %v4877_v14 }
 0x54a   :  { %v993_v2 = vpop.xlane.xlu0 %992  ;;  %4466 = vmatpush3.msra.mxu0 %v5205_v45 }
 0x54b   :  { %4776 = vpow2.f32 %v830_v1  ;;  %v994_v3 = vsub.f32 %v987_v49, %v993_v2  ;;  %4467 = vmatprep.subr.mxu0 %v4877_v14  ;;  %v5219_v49 = vld [vmem:[%s5839_s4 + $0x40] sm:$0xff] }
 0x54c   :  { %4468 = vmatpush3.msra.mxu0 %v5214_v46 }
 0x54d   :  { %v995_v4 = vmul.f32 1.442695, %v994_v3  ;;  %4469 = vmatprep.subr.mxu0 %v4877_v14 }
 0x54e   :  { %4470 = vmatpush3.msra.mxu0 %v5219_v49 }
 0x54f   :  { %4778 = vpow2.f32 %v995_v4  ;;  %4493 = vmatprep.subr.mxu0 %v4877_v14 }
 0x554   :  { %v4775_v5 = vpop.eup %4774 }
 0x555   :  { %v667_v6 = vsel %vm419_vm2, %v4775_v5, 0.0 }
 0x556   :  { %668 = vadd.xlane.f32.xlu0 %v667_v6 }
 0x558   :  { %v4777_v7 = vpop.eup %4776 }
 0x559   :  { %v832_v8 = vsel %vm419_vm2, %v4777_v7, 0.0 }
 0x55a   :  { %833 = vadd.xlane.f32.xlu1 %v832_v8 }
 0x55c   :  { %v4779_v9 = vpop.eup %4778 }
 0x55d   :  { %v997_v10 = vsel %vm419_vm2, %v4779_v9, 0.0 }
 0x55e   :  { %998 = vadd.xlane.f32.xlu0 %v997_v10 }
 0x56b   :  { %1002 = vrot.lane.b32.xlu1 %v5120_v57, %s4884_s20 }
 0x574   :  { %837 = vrot.lane.b32.xlu0 %v5120_v57, %s4885_s21 }
 0x5df   :  { %v669_v11 = vpop.xlane.xlu0 %668 }
 0x5e0   :  { %4780 = vrcp.f32 %v669_v11 }
 0x5e3   :  { %v834_v12 = vpop.xlane.xlu1 %833 }
 0x5e4   :  { %4782 = vrcp.f32 %v834_v12 }
 0x5e7   :  { %v999_v13 = vpop.xlane.xlu0 %998  ;;  %v1003_v57 = vpop.permute.xlu1 %1002 }
 0x5e8   :  { %4784 = vrcp.f32 %v999_v13 }
 0x5eb   :  { %v838_v38 = vpop.permute.xlu0 %837 }
 0x5ed   :  { %v4781_v27 = vpop.eup %4780 }
 0x5ee   :  { %v671_v36 = vmul.f32 %v4781_v27, %v4775_v5 }
 0x5f0   :  { %4441 = vmatmul.mubr.msk.f32.vlgmr.msra.gmra.mxu1 %vm419_vm2, %v671_v36 }
 0x5f1   :  { %v4783_v40 = vpop.eup %4782  ;;  %4449 = vmatpush3.msra.mxu1 %v838_v38  ;;  %4450 = vmatprep.mubr.msk.f32.mxu1 %vm4878_vm1, %v4877_v14 }
 0x5f2   :  { %4458 = vmatprep.subr.mxu1 %v4877_v14  ;;  %v836_v41 = vmul.f32 %v4783_v40, %v4777_v7 }
 0x5f4   :  { %4451 = vmatmul.mubr.msk.f32.vlgmr.msra.gmra.mxu1 %vm419_vm2, %v836_v41 }
 0x5f5   :  { %v4785_v42 = vpop.eup %4784  ;;  %4459 = vmatpush3.msra.mxu1 %v1003_v57  ;;  %4460 = vmatprep.mubr.msk.f32.mxu1 %vm4878_vm1, %v4877_v14 }
 0x5f6   :  { %v1001_v43 = vmul.f32 %v4785_v42, %v4779_v9  ;;  %4474 = vmatprep.subr.mxu1 %v4877_v14 }
 0x5f8   :  { %4461 = vmatmul.mubr.msk.f32.vlgmr.msra.gmra.mxu1 %vm419_vm2, %v1001_v43 }
 0x5f9   :  { %4490 = vmatprep.mubr.msk.f32.mxu1 %vm4878_vm1, %v4877_v14 }
 0x6b0   :  { %v744_v51 = vpop.f32.mrf.mxu1 }
 0x6b1   :  { %1079 = vrot.lane.b32.xlu1 %v744_v51, %s4886_s30 }
 0x6b2   :  { %v4442_v53 = vpop.f32.mrf.mxu1 }
 0x6b4   :  { %v909_v56 = vpop.f32.mrf.mxu1 }
 0x6b5   :  { %1083 = vrot.lane.b32.xlu1 %v909_v56, %s4887_s8 }
 0x6b6   :  { %v4452_v59 = vpop.f32.mrf.mxu1 }
 0x6b8   :  { %v1074_v60 = vpop.f32.mrf.mxu1 }
 0x6b9   :  { %1272 = vrot.lane.b32.xlu1 %v5132_v61, %s4888_s9  ;;  %1087 = vrot.lane.b32.xlu0 %v1074_v60, %s4889_s10 }
 0x6ba   :  { %v4462_v62 = vpop.f32.mrf.mxu1 }
 0x6bd   :  { %1270 = vrot.lane.b32.xlu0 %v5132_v61, %s4880_s16 }
 0x723   :  { %v1080_v63 = vpop.permute.xlu1 %1079 }
 0x724   :  { %v1090_v1 = vsel %vm419_vm2, %v5171_v39, %v1080_v63 }
 0x727   :  { %v1084_v0 = vpop.permute.xlu1 %1083 }
 0x728   :  { %v1092_v2 = vsel %vm1091_vm3, %v1090_v1, %v1084_v0 }
 0x72b   :  { %v1273_v3 = vpop.permute.xlu1 %1272  ;;  %v1088_v4 = vpop.permute.xlu0 %1087 }
 0x72c   :  { %v1094_v5 = vsel %vm1093_vm4, %v1092_v2, %v1088_v4 }
 0x72d   :  { %4472 = vmatmul.mubr.msk.f32.vlgmr.msra.gmra.mxu0 %vm77_vm0, %v1094_v5 }
 0x72e   :  { %4494 = vmatpush3.xpose.msk.msra.mxu0 %vm419_vm2, %v1273_v3  ;;  %4495 = vmatprep.mubr.msk.f32.mxu0 %vm4878_vm1, %v4877_v14 }
 0x72f   :  { %v1271_v6 = vpop.permute.xlu0 %1270  ;;  %4498 = vmatprep.subr.mxu0 %v4877_v14 }
 0x731   :  { %4496 = vmatmul.mubr.msk.f32.vlgmr.msra.gmra.mxu0 %vm419_vm2, %v1271_v6 }
 0x732   :  { %4500 = vmatprep.mubr.msk.f32.mxu0 %vm4878_vm1, %v4877_v14 }
 0x7ed   :  { %v5244_v39 = vpop.f32.mrf.mxu0 }
 0x7ef   :  { %v4473_v7 = vpop.f32.mrf.mxu0 }
 0x7f1   :  { %v1344_v8 = vpop.f32.mrf.mxu0 }
 0x7f2   :  { %v1348_v9 = vsel %vm419_vm2, %v1344_v8, -inf }
 0x7f3   :  { %1349 = vmax.xlane.f32.xlu1 %v1348_v9  ;;  %v4497_v10 = vpop.f32.mrf.mxu0  ;;  %v5298_v9 = vld [vmem:[%s5839_s4 + $0xb0] sm:$0xff] }
 0x7f4   :  { %v5305_v10 = vld [vmem:[%s5839_s4 + $0xa8] sm:$0xff] }
 0x804   :  { %1437 = vrot.lane.b32.xlu1 %v5132_v61, %s4890_s11 }
 0x808   :  { %1435 = vrot.lane.b32.xlu1 %v5132_v61, %s4883_s19 }
 0x80c   :  { %1600 = vrot.lane.b32.xlu1 %v5132_v61, %s4885_s21 }
 0x810   :  { %1765 = vrot.lane.b32.xlu1 %v5132_v61, %s4884_s20 }
 0x87c   :  { %v1350_v11 = vpop.xlane.xlu1 %1349 }
 0x87d   :  { %v1351_v12 = vsub.f32 %v1344_v8, %v1350_v11  ;;  %v5293_v8 = vld [vmem:[%s5839_s4 + $0xb8] sm:$0xff]  ;;  %v5312_v11 = vld [vmem:[%s5839_s4 + $0xa0] sm:$0xff] }
 0x87e   :  { %4475 = vmatpush3.msra.mxu1 %v5293_v8 }
 0x87f   :  { %v1352_v13 = vmul.f32 1.442695, %v1351_v12  ;;  %4476 = vmatprep.subr.mxu1 %v4877_v14 }
 0x880   :  { %v1438_v41 = vpop.permute.xlu1 %1437  ;;  %4477 = vmatpush3.msra.mxu1 %v5298_v9 }
 0x881   :  { %4786 = vpow2.f32 %v1352_v13  ;;  %4478 = vmatprep.subr.mxu1 %v4877_v14 }
 0x882   :  { %4479 = vmatpush3.msra.mxu1 %v5305_v10 }
 0x883   :  { %4480 = vmatprep.subr.mxu1 %v4877_v14 }
 0x884   :  { %v1436_v43 = vpop.permute.xlu1 %1435  ;;  %4481 = vmatpush3.msra.mxu1 %v5312_v11 }
 0x885   :  { %4482 = vmatprep.subr.mxu1 %v4877_v14 }
 0x888   :  { %v1601_v53 = vpop.permute.xlu1 %1600 }
 0x88c   :  { %v1766_v59 = vpop.permute.xlu1 %1765 }
 0x88e   :  { %v4787_v27 = vpop.eup %4786 }
 0x88f   :  { %v1354_v36 = vsel %vm419_vm2, %v4787_v27, 0.0 }
 0x890   :  { %1355 = vadd.xlane.f32.xlu0 %v1354_v36 }
 0x8a6   :  { %1359 = vrot.lane.b32.xlu0 %v5132_v61, %s4891_s3 }
 0x8aa   :  { %1602 = vrot.lane.b32.xlu0 %v5132_v61, %s4892_s12 }
 0x8ae   :  { %1767 = vrot.lane.b32.xlu0 %v5132_v61, %s4893_s13 }
 0x919   :  { %v1356_v38 = vpop.xlane.xlu0 %1355 }
 0x91a   :  { %4788 = vrcp.f32 %v1356_v38 }
 0x91d   :  { %v1360_v40 = vpop.permute.xlu0 %1359 }
 0x91e   :  { %4499 = vmatpush3.msra.mxu0 %v1360_v40 }
 0x91f   :  { %4503 = vmatprep.subr.mxu0 %v4877_v14 }
 0x921   :  { %v1603_v51 = vpop.permute.xlu0 %1602 }
 0x925   :  { %v1768_v56 = vpop.permute.xlu0 %1767 }
 0x927   :  { %v4789_v57 = vpop.eup %4788 }
 0x928   :  { %v1358_v42 = vmul.f32 %v4789_v57, %v4787_v27 }
 0x92a   :  { %4501 = vmatmul.mubr.msk.f32.vlgmr.msra.gmra.mxu0 %vm419_vm2, %v1358_v42 }
 0x92b   :  { %4504 = vmatpush3.xpose.msk.msra.mxu0 %vm419_vm2, %v1438_v41  ;;  %4505 = vmatprep.mubr.msk.f32.mxu0 %vm4878_vm1, %v4877_v14 }
 0x92c   :  { %4513 = vmatprep.subr.mxu0 %v4877_v14 }
 0x92e   :  { %4506 = vmatmul.mubr.msk.f32.vlgmr.msra.gmra.mxu0 %vm419_vm2, %v1436_v43 }
 0x92f   :  { %4514 = vmatpush3.xpose.msk.msra.mxu0 %vm419_vm2, %v1603_v51  ;;  %4515 = vmatprep.mubr.msk.f32.mxu0 %vm4878_vm1, %v4877_v14 }
 0x930   :  { %4523 = vmatprep.subr.mxu0 %v4877_v14 }
 0x932   :  { %4516 = vmatmul.mubr.msk.f32.vlgmr.msra.gmra.mxu0 %vm419_vm2, %v1601_v53 }
 0x933   :  { %4524 = vmatpush3.xpose.msk.msra.mxu0 %vm419_vm2, %v1768_v56  ;;  %4525 = vmatprep.mubr.msk.f32.mxu0 %vm4878_vm1, %v4877_v14 }
 0x934   :  { %4533 = vmatprep.subr.mxu0 %v4877_v14 }
 0x936   :  { %4526 = vmatmul.mubr.msk.f32.vlgmr.msra.gmra.mxu0 %vm419_vm2, %v1766_v59 }
 0x937   :  { %4541 = vmatprep.mubr.msk.f32.mxu0 %vm4878_vm1, %v4877_v14 }
 0x9ea   :  { %v5281_v60 = vpop.f32.mrf.mxu0 }
 0x9ec   :  { %v4502_v62 = vpop.f32.mrf.mxu0 }
 0x9ee   :  { %v1509_v63 = vpop.f32.mrf.mxu0 }
 0x9ef   :  { %v1513_v0 = vsel %vm419_vm2, %v1509_v63, -inf }
 0x9f0   :  { %1514 = vmax.xlane.f32.xlu0 %v1513_v0  ;;  %v4507_v1 = vpop.f32.mrf.mxu0  ;;  %v5329_v0 = vld [vmem:[%s5839_s4 + $0x90] sm:$0xff] }
 0x9f1   :  { %v5338_v1 = vld [vmem:[%s5839_s4 + $0x88] sm:$0xff] }
 0x9f2   :  { %v1674_v2 = vpop.f32.mrf.mxu0 }
 0x9f3   :  { %v1678_v3 = vsel %vm419_vm2, %v1674_v2, -inf }
 0x9f4   :  { %1679 = vmax.xlane.f32.xlu1 %v1678_v3  ;;  %v4517_v4 = vpop.f32.mrf.mxu0 }
 0x9f5   :  { %v5356_v4 = vrot.slane %v5071_v33, %v257_v55 }
 0x9f6   :  { %v1839_v5 = vpop.f32.mrf.mxu0 }
 0x9f7   :  { %v1843_v6 = vsel %vm419_vm2, %v1839_v5, -inf }
 0x9f8   :  { %1844 = vmax.xlane.f32.xlu0 %v1843_v6  ;;  %v4527_v7 = vpop.f32.mrf.mxu0  ;;  %v5361_v6 = vrot.slane %v5071_v33, %v334_v52 }
 0x9f9   :  { %v413_v7 = vmul.f32 %v5356_v4, %v5100_v47 }
 0xa05   :  { %1524 = vrot.lane.b32.xlu1 %v5132_v61, %s4889_s10 }
 0xa09   :  { %1689 = vrot.lane.b32.xlu1 %v5132_v61, %s4887_s8 }
 0xa79   :  { %v1515_v12 = vpop.xlane.xlu0 %1514 }
 0xa7a   :  { %v1516_v13 = vsub.f32 %v1509_v63, %v1515_v12  ;;  %v5324_v63 = vld [vmem:[%s5839_s4 + $0x98] sm:$0xff] }
 0xa7b   :  { %4483 = vmatpush3.msra.mxu1 %v5324_v63 }
 0xa7c   :  { %v1517_v27 = vmul.f32 1.442695, %v1516_v13  ;;  %4484 = vmatprep.subr.mxu1 %v4877_v14  ;;  %v5366_v13 = vadd.f32 %v5361_v6, %v413_v7 }
 0xa7d   :  { %v1680_v36 = vpop.xlane.xlu1 %1679  ;;  %4485 = vmatpush3.msra.mxu1 %v5329_v0 }
 0xa7e   :  { %4790 = vpow2.f32 %v1517_v27  ;;  %v1681_v38 = vsub.f32 %v1674_v2, %v1680_v36  ;;  %4486 = vmatprep.subr.mxu1 %v4877_v14  ;;  %v5343_v2 = vld [vmem:[%s5839_s4 + $0x80] sm:$0xff] }
 0xa7f   :  { %4487 = vmatpush3.msra.mxu1 %v5338_v1 }
 0xa80   :  { %v1682_v40 = vmul.f32 1.442695, %v1681_v38  ;;  %4488 = vmatprep.subr.mxu1 %v4877_v14 }
 0xa81   :  { %v1845_v41 = vpop.xlane.xlu0 %1844  ;;  %4489 = vmatpush3.msra.mxu1 %v5343_v2  ;;  %v1525_v3 = vpop.permute.xlu1 %1524 }
 0xa82   :  { %4792 = vpow2.f32 %v1682_v40  ;;  %v1846_v57 = vsub.f32 %v1839_v5, %v1845_v41  ;;  %4508 = vmatprep.subr.mxu1 %v4877_v14 }
 0xa84   :  { %v1847_v42 = vmul.f32 1.442695, %v1846_v57 }
 0xa86   :  { %4794 = vpow2.f32 %v1847_v42 }
 0xa8b   :  { %v4791_v43 = vpop.eup %4790 }
 0xa8c   :  { %v1519_v51 = vsel %vm419_vm2, %v4791_v43, 0.0 }
 0xa8d   :  { %1520 = vadd.xlane.f32.xlu0 %v1519_v51  ;;  %v5395_v51 = vld [vmem:[%s5839_s4 + $0x70] sm:$0xff] }
 0xa8f   :  { %v4793_v53 = vpop.eup %4792 }
 0xa90   :  { %v1684_v56 = vsel %vm419_vm2, %v4793_v53, 0.0 }
 0xa91   :  { %1685 = vadd.xlane.f32.xlu0 %v1684_v56 }
 0xa93   :  { %v4795_v59 = vpop.eup %4794 }
 0xa94   :  { %v1849_v62 = vsel %vm419_vm2, %v4795_v59, 0.0 }
 0xa95   :  { %1850 = vadd.xlane.f32.xlu1 %v1849_v62  ;;  %v5411_v62 = vld [vmem:[%s5839_s4 + $0x60] sm:$0xff] }
 0xaa6   :  { %1854 = vrot.lane.b32.xlu1 %v5132_v61, %s4886_s30  ;;  %v1690_v61 = vpop.permute.xlu1 %1689 }
 0xaa7   :  { %1169 = vrot.lane.b32.xlu0 %v5244_v39, %s4891_s3 }
 0xb16   :  { %v1521_v5 = vpop.xlane.xlu0 %1520 }
 0xb17   :  { %4796 = vrcp.f32 %v1521_v5 }
 0xb1a   :  { %v1686_v12 = vpop.xlane.xlu0 %1685 }
 0xb1b   :  { %4798 = vrcp.f32 %v1686_v12 }
 0xb1e   :  { %v1851_v27 = vpop.xlane.xlu1 %1850  ;;  %v1170_v55 = vpop.permute.xlu0 %1169 }
 0xb1f   :  { %4800 = vrcp.f32 %v1851_v27  ;;  %v1172_v36 = vsel %vm77_vm0, %v5366_v13, %v1170_v55  ;;  %v72_v55 = vld [vmem:[%s5836_s1 + $0x8] sm:$0xff] }
 0xb20   :  { %4491 = vmatmul.mubr.msk.f32.vlgmr.msra.gmra.mxu1 %vm1176_vm5, %v1172_v36  ;;  %v70_v36 = vld [vmem:[%s5835_s0 + $0x8] sm:$0xff] }
 0xb21   :  { %4509 = vmatpush3.msra.mxu1 %v1525_v3  ;;  %4510 = vmatprep.mubr.msk.f32.mxu1 %vm4878_vm1, %v4877_v14 }
 0xb22   :  { %4518 = vmatprep.subr.mxu1 %v4877_v14  ;;  %v1855_v41 = vpop.permute.xlu1 %1854 }
 0xb24   :  { %v4797_v33 = vpop.eup %4796 }
 0xb25   :  { %v1523_v52 = vmul.f32 %v4797_v33, %v4791_v43  ;;  %v5388_v43 = vld [vmem:[%s5839_s4 + $0x78] sm:$0xff]  ;;  %v2272_v33 = vsel %vm77_vm0, %v72_v55, 0.0 }
 0xb26   :  { %4534 = vmatpush3.msra.mxu0 %v5388_v43 }
 0xb27   :  { %4511 = vmatmul.mubr.msk.f32.vlgmr.msra.gmra.mxu1 %vm419_vm2, %v1523_v52  ;;  %4535 = vmatprep.subr.mxu0 %v4877_v14  ;;  %v2285_v52 = vsel %vm77_vm0, %v70_v36, 0.0 }
 0xb28   :  { %v4799_v38 = vpop.eup %4798  ;;  %4519 = vmatpush3.msra.mxu1 %v1690_v61  ;;  %4520 = vmatprep.mubr.msk.f32.mxu1 %vm4878_vm1, %v4877_v14 }
 0xb29   :  { %4528 = vmatprep.subr.mxu1 %v4877_v14  ;;  %v1688_v40 = vmul.f32 %v4799_v38, %v4793_v53  ;;  %v5400_v53 = vld [vmem:[%s5839_s4 + $0x68] sm:$0xff]  ;;  %4536 = vmatpush3.msra.mxu0 %v5395_v51 }
 0xb2a   :  { %4537 = vmatprep.subr.mxu0 %v4877_v14 }
 0xb2b   :  { %4521 = vmatmul.mubr.msk.f32.vlgmr.msra.gmra.mxu1 %vm419_vm2, %v1688_v40  ;;  %4538 = vmatpush3.msra.mxu0 %v5400_v53 }
 0xb2c   :  { %v4801_v57 = vpop.eup %4800  ;;  %4529 = vmatpush3.msra.mxu1 %v1855_v41  ;;  %4530 = vmatprep.mubr.msk.f32.mxu1 %vm4878_vm1, %v4877_v14 }
 0xb2d   :  { %v1853_v42 = vmul.f32 %v4801_v57, %v4795_v59  ;;  %4544 = vmatprep.subr.mxu1 %v4877_v14  ;;  %4539 = vmatprep.subr.mxu0 %v4877_v14 }
 0xb2e   :  { %4540 = vmatpush3.msra.mxu0 %v5411_v62 }
 0xb2f   :  { %4531 = vmatmul.mubr.msk.f32.vlgmr.msra.gmra.mxu1 %vm419_vm2, %v1853_v42  ;;  %4563 = vmatprep.subr.mxu0 %v4877_v14 }
 0xb30   :  { %4560 = vmatprep.mubr.msk.f32.mxu1 %vm4878_vm1, %v4877_v14 }
 0xbe0   :  { %v5402_v56 = vpop.f32.mrf.mxu1 }
 0xbe2   :  { %v4492_v59 = vpop.f32.mrf.mxu1 }
 0xbe7   :  { %v1596_v3 = vpop.f32.mrf.mxu1 }
 0xbe8   :  { %1931 = vrot.lane.b32.xlu0 %v1596_v3, %s4886_s30  ;;  %v5491_v3 = vld [vmem:[%s5839_s4 + $0xe0] sm:$0xff] }
 0xbe9   :  { %v4512_v5 = vpop.f32.mrf.mxu1 }
 0xbea   :  { %v5498_v5 = vld [vmem:[%s5839_s4 + $0xd8] sm:$0xff] }
 0xbeb   :  { %v1761_v7 = vpop.f32.mrf.mxu1 }
 0xbec   :  { %1935 = vrot.lane.b32.xlu1 %v1761_v7, %s4887_s8  ;;  %v5505_v7 = vld [vmem:[%s5839_s4 + $0xd0] sm:$0xff] }
 0xbed   :  { %v4522_v61 = vpop.f32.mrf.mxu1 }
 0xbee   :  { %v5512_v61 = vld [vmem:[%s5839_s4 + $0xc8] sm:$0xff] }
 0xbef   :  { %v1926_v12 = vpop.f32.mrf.mxu1 }
 0xbf0   :  { %1939 = vrot.lane.b32.xlu0 %v1926_v12, %s4889_s10  ;;  %v5519_v12 = vld [vmem:[%s5839_s4 + $0xc0] sm:$0xff] }
 0xbf1   :  { %v4532_v27 = vpop.f32.mrf.mxu1 }
 0xc0f   :  { %2273 = vadd.xlane.f32.xlu0 %v2272_v33 }
 0xc10   :  { %2286 = vadd.xlane.f32.xlu1 %v2285_v52 }
 0xc5a   :  { %v1932_v38 = vpop.permute.xlu0 %1931 }
 0xc5b   :  { %v1942_v41 = vsel %vm419_vm2, %v5281_v60, %v1932_v38  ;;  %v5484_v60 = vld [vmem:[%s5839_s4 + $0xe8] sm:$0xff] }
 0xc5e   :  { %v1936_v40 = vpop.permute.xlu1 %1935 }
 0xc5f   :  { %v1943_v57 = vsel %vm1091_vm3, %v1942_v41, %v1936_v40 }
 0xc62   :  { %v1940_v42 = vpop.permute.xlu0 %1939 }
 0xc63   :  { %v1944_v59 = vsel %vm1093_vm4, %v1943_v57, %v1940_v42 }
 0xc64   :  { %4542 = vmatmul.mubr.msk.f32.vlgmr.msra.gmra.mxu0 %vm77_vm0, %v1944_v59 }
 0xc65   :  { %4564 = vmatpush3.msra.mxu0 %v4972_v17  ;;  %4571 = vmatprep.mubr.msk.f32.mxu0 %vm4878_vm1, %v4877_v14 }
 0xc66   :  { %4565 = vmatprep.subr.mxu0 %v4877_v14 }
 0xc67   :  { %4566 = vmatpush3.msra.mxu0 %v4984_v19 }
 0xc68   :  { %4567 = vmatprep.subr.mxu0 %v4877_v14 }
 0xc69   :  { %4568 = vmatpush3.msra.mxu0 %v4998_v21 }
 0xc6a   :  { %4569 = vmatprep.subr.mxu0 %v4877_v14 }
 0xc6b   :  { %4570 = vmatpush3.msra.mxu0 %v5013_v23 }
 0xc6c   :  { %4574 = vmatprep.subr.mxu0 %v4877_v14  ;;  %4572 = vmatmul.mubr.msk.f32.vlgmr.msra.gmra.mxu0 %vm77_vm0, %v70_v36 }
 0xc6d   :  { %4575 = vmatpush3.msra.mxu0 %v4958_v15  ;;  %4582 = vmatprep.mubr.msk.f32.mxu0 %vm4878_vm1, %v4877_v14 }
 0xc6e   :  { %4576 = vmatprep.subr.mxu0 %v4877_v14 }
 0xc6f   :  { %4577 = vmatpush3.msra.mxu0 %v4966_v16 }
 0xc70   :  { %4578 = vmatprep.subr.mxu0 %v4877_v14 }
 0xc71   :  { %4579 = vmatpush3.msra.mxu0 %v4979_v18 }
 0xc72   :  { %4580 = vmatprep.subr.mxu0 %v4877_v14 }
 0xc73   :  { %4581 = vmatpush3.msra.mxu0 %v4989_v20 }
 0xc74   :  { %4596 = vmatprep.subr.mxu0 %v4877_v14  ;;  %4583 = vmatmul.mubr.msk.f32.vlgmr.msra.gmra.mxu0 %vm77_vm0, %v72_v55 }
 0xc75   :  { %4597 = vmatpush3.msra.mxu0 %v5006_v22  ;;  %4604 = vmatprep.mubr.msk.f32.mxu0 %vm4878_vm1, %v4877_v14 }
 0xc76   :  { %4598 = vmatprep.subr.mxu0 %v4877_v14 }
 0xc77   :  { %4599 = vmatpush3.msra.mxu0 %v5022_v24 }
 0xc78   :  { %4600 = vmatprep.subr.mxu0 %v4877_v14 }
 0xc79   :  { %4601 = vmatpush3.msra.mxu0 %v5037_v26  ;;  %v5472_v26 = vld [vmem:[%s5839_s4 + $0xf8] sm:$0xff] }
 0xc7a   :  { %4602 = vmatprep.subr.mxu0 %v4877_v14  ;;  %4545 = vmatpush3.msra.mxu1 %v5472_v26 }
 0xc7b   :  { %4603 = vmatpush3.msra.mxu0 %v5051_v29  ;;  %v5477_v29 = vld [vmem:[%s5839_s4 + $0xf0] sm:$0xff]  ;;  %4546 = vmatprep.subr.mxu1 %v4877_v14 }
 0xc7c   :  { %4617 = vmatprep.subr.mxu0 %v4877_v14  ;;  %4547 = vmatpush3.msra.mxu1 %v5477_v29 }
 0xc7d   :  { %4548 = vmatprep.subr.mxu1 %v4877_v14 }
 0xc7e   :  { %4549 = vmatpush3.msra.mxu1 %v5484_v60 }
 0xc7f   :  { %4550 = vmatprep.subr.mxu1 %v4877_v14 }
 0xc80   :  { %4551 = vmatpush3.msra.mxu1 %v5491_v3 }
 0xc81   :  { %4552 = vmatprep.subr.mxu1 %v4877_v14 }
 0xc82   :  { %4553 = vmatpush3.msra.mxu1 %v5498_v5 }
 0xc83   :  { %4554 = vmatprep.subr.mxu1 %v4877_v14 }
 0xc84   :  { %4555 = vmatpush3.msra.mxu1 %v5505_v7 }
 0xc85   :  { %4556 = vmatprep.subr.mxu1 %v4877_v14 }
 0xc86   :  { %4557 = vmatpush3.msra.mxu1 %v5512_v61 }
 0xc87   :  { %4558 = vmatprep.subr.mxu1 %v4877_v14 }
 0xc88   :  { %4559 = vmatpush3.msra.mxu1 %v5519_v12 }
 0xc89   :  { %4585 = vmatprep.subr.mxu1 %v4877_v14 }
 0xc98   :  { %v2274_v15 = vpop.xlane.xlu0 %2273 }
 0xc99   :  { %v2287_v16 = vpop.xlane.xlu1 %2286  ;;  %v2275_v17 = vmul.f32 0.03125, %v2274_v15 }
 0xc9a   :  { %v2288_v18 = vmul.f32 0.03125, %v2287_v16 }
 0xc9b   :  { %v5463_v19 = vsub.f32 %v72_v55, %v2275_v17 }
 0xc9c   :  { %v2289_v20 = vsub.f32 %v70_v36, %v2288_v18  ;;  %v1264_v18 = vmul.f32 %v5086_v35, %v5100_v47 }
 0xc9d   :  { %v2277_v22 = vmul.f32 %v5463_v19, %v5463_v19 }
 0xc9e   :  { %v2290_v21 = vmul.f32 %v2289_v20, %v2289_v20 }
 0xc9f   :  { %v2278_v24 = vsel %vm77_vm0, %v2277_v22, 0.0 }
 0xca0   :  { %v2291_v23 = vsel %vm77_vm0, %v2290_v21, 0.0  ;;  %v5539_v21 = vadd.f32 %v5092_v37, %v1264_v18 }
 0xca1   :  { %2292 = vadd.xlane.f32.xlu0 %v2291_v23 }
 0xca5   :  { %2279 = vadd.xlane.f32.xlu0 %v2278_v24 }
 0xd24   :  { %v5525_v27 = vpop.f32.mrf.mxu0 }
 0xd25   :  { %2019 = vrot.lane.b32.xlu1 %v5525_v27, %s4891_s3 }
 0xd26   :  { %v4543_v55 = vpop.f32.mrf.mxu0 }
 0xd2a   :  { %v2293_v36 = vpop.xlane.xlu0 %2292 }
 0xd2b   :  { %v2294_v33 = vmul.f32 0.03125, %v2293_v36 }
 0xd2c   :  { %v5529_v52 = vpop.f32.mrf.mxu0 }
 0xd2d   :  { %v2295_v38 = vadd.f32 1e-05, %v2294_v33 }
 0xd2e   :  { %v4573_v40 = vpop.f32.mrf.mxu0  ;;  %v2280_v15 = vpop.xlane.xlu0 %2279 }
 0xd2f   :  { %4802 = vrsqrt.f32 %v2295_v38  ;;  %v2281_v16 = vmul.f32 0.03125, %v2280_v15 }
 0xd31   :  { %v2282_v17 = vadd.f32 1e-05, %v2281_v16 }
 0xd33   :  { %4804 = vrsqrt.f32 %v2282_v17 }
 0xd34   :  { %v5531_v41 = vpop.f32.mrf.mxu0 }
 0xd36   :  { %v4584_v57 = vpop.f32.mrf.mxu0 }
 0xd3c   :  { %v4803_v42 = vpop.eup %4802 }
 0xd3d   :  { %v2297_v59 = vmul.f32 %v4803_v42, %v2289_v20 }
 0xd3f   :  { %4605 = vmatmul.mubr.msk.f32.vlgmr.msra.gmra.mxu0 %vm77_vm0, %v2297_v59 }
 0xd40   :  { %4619 = vmatprep.mubr.msk.f32.mxu0 %vm4878_vm1, %v4877_v14  ;;  %v4805_v20 = vpop.eup %4804 }
 0xd41   :  { %v5553_v47 = vmul.f32 %v4805_v20, %v5463_v19 }
 0xd97   :  { %v2020_v22 = vpop.permute.xlu1 %2019 }
 0xd98   :  { %v2022_v23 = vsel %vm77_vm0, %v5539_v21, %v2020_v22 }
 0xd99   :  { %4561 = vmatmul.mubr.msk.f32.vlgmr.msra.gmra.mxu1 %vm1176_vm5, %v2022_v23 }
 0xd9a   :  { %4586 = vmatpush3.msra.mxu1 %v5030_v25  ;;  %4593 = vmatprep.mubr.msk.f32.mxu1 %vm4878_vm1, %v4877_v14 }
 0xd9b   :  { %4587 = vmatprep.subr.mxu1 %v4877_v14 }
 0xd9c   :  { %4588 = vmatpush3.msra.mxu1 %v5044_v28 }
 0xd9d   :  { %4589 = vmatprep.subr.mxu1 %v4877_v14 }
 0xd9e   :  { %4590 = vmatpush3.msra.mxu1 %v5062_v31 }
 0xd9f   :  { %4591 = vmatprep.subr.mxu1 %v4877_v14 }
 0xda0   :  { %4592 = vmatpush3.msra.mxu1 %v5077_v34 }
 0xda1   :  { %4594 = vmatmul.mubr.msk.f32.vlgmr.msra.gmra.mxu1 %vm77_vm0, %v5553_v47  ;;  %4607 = vmatprep.subr.mxu1 %v4877_v14 }
 0xda2   :  { %4609 = vmatprep.mubr.msk.f32.mxu1 %vm4878_vm1, %v4877_v14 }
 0xdff   :  { %v2440_v25 = vpop.f32.mrf.mxu0 }
 0xe00   :  { %v5562_v28 = vadd.f32 %v2440_v25, %v5116_v54 }
 0xe01   :  { %v4606_v31 = vpop.f32.mrf.mxu0 }
 0xe02   :  { %2776 = vrot.lane.b32.xlu1 %v5562_v28, %s4881_s17  ;;  %2611 = vrot.lane.b32.xlu0 %v5562_v28, %s4879_s15 }
 0xe03   :  { %4608 = vmatpush3.xpose.msk.msra.mxu1 %vm419_vm2, %v5562_v28 }
 0xe04   :  { %4612 = vmatprep.subr.mxu1 %v4877_v14 }
 0xe06   :  { %2941 = vrot.lane.b32.xlu0 %v5562_v28, %s4882_s18 }
 0xe59   :  { %v5573_v34 = vpop.f32.mrf.mxu1 }
 0xe5b   :  { %v4562_v19 = vpop.f32.mrf.mxu1 }
 0xe61   :  { %v2367_v54 = vpop.f32.mrf.mxu1 }
 0xe62   :  { %v5576_v24 = vadd.f32 %v2367_v54, %v5124_v58 }
 0xe63   :  { %v4595_v55 = vpop.f32.mrf.mxu1 }
 0xe64   :  { %2609 = vrot.lane.b32.xlu1 %v5576_v24, %s4879_s15  ;;  %4610 = vmatmul.mubr.msk.f32.vlgmr.msra.gmra.mxu1 %vm419_vm2, %v5576_v24 }
 0xe65   :  { %4614 = vmatprep.mubr.msk.f32.mxu1 %vm4878_vm1, %v4877_v14 }
 0xe68   :  { %2774 = vrot.lane.b32.xlu1 %v5576_v24, %s4881_s17 }
 0xe6c   :  { %2939 = vrot.lane.b32.xlu1 %v5576_v24, %s4882_s18 }
 0xe74   :  { %v2612_v36 = vpop.permute.xlu0 %2611  ;;  %v2777_v58 = vpop.permute.xlu1 %2776 }
 0xe75   :  { %4618 = vmatpush3.xpose.msk.msra.mxu0 %vm419_vm2, %v2612_v36 }
 0xe76   :  { %4627 = vmatprep.subr.mxu0 %v4877_v14 }
 0xe78   :  { %v2942_v40 = vpop.permute.xlu0 %2941 }
 0xed6   :  { %v2610_v33 = vpop.permute.xlu1 %2609 }
 0xed7   :  { %4620 = vmatmul.mubr.msk.f32.vlgmr.msra.gmra.mxu0 %vm419_vm2, %v2610_v33 }
 0xed8   :  { %4628 = vmatpush3.xpose.msk.msra.mxu0 %vm419_vm2, %v2777_v58  ;;  %4629 = vmatprep.mubr.msk.f32.mxu0 %vm4878_vm1, %v4877_v14 }
 0xed9   :  { %4637 = vmatprep.subr.mxu0 %v4877_v14 }
 0xeda   :  { %v2775_v38 = vpop.permute.xlu1 %2774 }
 0xedb   :  { %4630 = vmatmul.mubr.msk.f32.vlgmr.msra.gmra.mxu0 %vm419_vm2, %v2775_v38 }
 0xedc   :  { %4638 = vmatpush3.xpose.msk.msra.mxu0 %vm419_vm2, %v2942_v40  ;;  %4639 = vmatprep.mubr.msk.f32.mxu0 %vm4878_vm1, %v4877_v14 }
 0xedd   :  { %4647 = vmatprep.subr.mxu0 %v4877_v14 }
 0xede   :  { %v2940_v57 = vpop.permute.xlu1 %2939 }
 0xedf   :  { %4640 = vmatmul.mubr.msk.f32.vlgmr.msra.gmra.mxu0 %vm419_vm2, %v2940_v57 }
 0xee0   :  { %4648 = vmatpush3.msra.mxu0 %v5200_v44  ;;  %4655 = vmatprep.mubr.msk.f32.mxu0 %vm4878_vm1, %v4877_v14 }
 0xee1   :  { %4649 = vmatprep.subr.mxu0 %v4877_v14 }
 0xee2   :  { %4650 = vmatpush3.msra.mxu0 %v5205_v45 }
 0xee3   :  { %4651 = vmatprep.subr.mxu0 %v4877_v14 }
 0xee4   :  { %4652 = vmatpush3.msra.mxu0 %v5214_v46 }
 0xee5   :  { %4653 = vmatprep.subr.mxu0 %v4877_v14 }
 0xee6   :  { %4654 = vmatpush3.msra.mxu0 %v5219_v49 }
 0xee7   :  { %4677 = vmatprep.subr.mxu0 %v4877_v14 }
 0xf24   :  { %v2518_v42 = vpop.f32.mrf.mxu1 }
 0xf25   :  { %v2522_v44 = vsel %vm419_vm2, %v2518_v42, -inf }
 0xf26   :  { %2523 = vmax.xlane.f32.xlu0 %v2522_v44  ;;  %v4611_v59 = vpop.f32.mrf.mxu1 }
 0xf97   :  { %v2683_v15 = vpop.f32.mrf.mxu0 }
 0xf98   :  { %v2687_v16 = vsel %vm419_vm2, %v2683_v15, -inf }
 0xf99   :  { %2688 = vmax.xlane.f32.xlu1 %v2687_v16  ;;  %v4621_v45 = vpop.f32.mrf.mxu0 }
 0xf9b   :  { %v2848_v17 = vpop.f32.mrf.mxu0 }
 0xf9c   :  { %v2852_v18 = vsel %vm419_vm2, %v2848_v17, -inf }
 0xf9d   :  { %2853 = vmax.xlane.f32.xlu0 %v2852_v18  ;;  %v4631_v46 = vpop.f32.mrf.mxu0 }
 0xf9f   :  { %v3013_v22 = vpop.f32.mrf.mxu0 }
 0xfa0   :  { %v3017_v49 = vsel %vm419_vm2, %v3013_v22, -inf }
 0xfa1   :  { %3018 = vmax.xlane.f32.xlu0 %v3017_v49  ;;  %v4641_v23 = vpop.f32.mrf.mxu0 }
 0xfaf   :  { %v2524_v20 = vpop.xlane.xlu0 %2523 }
 0xfb0   :  { %v2525_v25 = vsub.f32 %v2518_v42, %v2524_v20 }
 0xfb2   :  { %v2526_v31 = vmul.f32 1.442695, %v2525_v25 }
 0xfb4   :  { %4806 = vpow2.f32 %v2526_v31 }
 0xfc1   :  { %v4807_v19 = vpop.eup %4806 }
 0xfc2   :  { %v2528_v54 = vsel %vm419_vm2, %v4807_v19, 0.0 }
 0xfc3   :  { %2529 = vadd.xlane.f32.xlu0 %v2528_v54 }
0x1022   :  { %v2689_v55 = vpop.xlane.xlu1 %2688 }
0x1023   :  { %v2690_v36 = vsub.f32 %v2683_v15, %v2689_v55 }
0x1025   :  { %v2691_v58 = vmul.f32 1.442695, %v2690_v36 }
0x1026   :  { %v2854_v33 = vpop.xlane.xlu0 %2853 }
0x1027   :  { %4808 = vpow2.f32 %v2691_v58  ;;  %v2855_v38 = vsub.f32 %v2848_v17, %v2854_v33 }
0x1029   :  { %v2856_v40 = vmul.f32 1.442695, %v2855_v38 }
0x102a   :  { %v3019_v15 = vpop.xlane.xlu0 %3018 }
0x102b   :  { %4810 = vpow2.f32 %v2856_v40  ;;  %v3020_v16 = vsub.f32 %v3013_v22, %v3019_v15 }
0x102d   :  { %v3021_v45 = vmul.f32 1.442695, %v3020_v16 }
0x102f   :  { %4812 = vpow2.f32 %v3021_v45 }
0x1034   :  { %v4809_v57 = vpop.eup %4808 }
0x1035   :  { %v2693_v44 = vsel %vm419_vm2, %v4809_v57, 0.0 }
0x1036   :  { %2694 = vadd.xlane.f32.xlu1 %v2693_v44 }
0x1038   :  { %v4811_v59 = vpop.eup %4810 }
0x1039   :  { %v2858_v42 = vsel %vm419_vm2, %v4811_v59, 0.0 }
0x103a   :  { %2859 = vadd.xlane.f32.xlu0 %v2858_v42 }
0x103c   :  { %v4813_v17 = vpop.eup %4812 }
0x103d   :  { %v3023_v18 = vsel %vm419_vm2, %v4813_v17, 0.0 }
0x1047   :  { %2698 = vrot.lane.b32.xlu1 %v5562_v28, %s4883_s19 }
0x104b   :  { %2863 = vrot.lane.b32.xlu1 %v5562_v28, %s4885_s21 }
0x104c   :  { %v2530_v46 = vpop.xlane.xlu0 %2529 }
0x104d   :  { %4814 = vrcp.f32 %v2530_v46 }
0x1050   :  { %2533 = vrot.lane.b32.xlu0 %v5562_v28, %s4880_s16 }
0x105a   :  { %v4815_v20 = vpop.eup %4814 }
0x105b   :  { %v2532_v31 = vmul.f32 %v4815_v20, %v4807_v19 }
0x106f   :  { %3024 = vadd.xlane.f32.xlu1 %v3023_v18 }
0x1080   :  { %3028 = vrot.lane.b32.xlu1 %v5562_v28, %s4884_s20 }
0x10bf   :  { %v2695_v49 = vpop.xlane.xlu1 %2694 }
0x10c0   :  { %4816 = vrcp.f32 %v2695_v49 }
0x10c3   :  { %v2860_v23 = vpop.xlane.xlu0 %2859  ;;  %v2699_v22 = vpop.permute.xlu1 %2698 }
0x10c4   :  { %4818 = vrcp.f32 %v2860_v23 }
0x10c7   :  { %v2534_v25 = vpop.permute.xlu0 %2533  ;;  %v2864_v55 = vpop.permute.xlu1 %2863 }
0x10c8   :  { %4613 = vmatpush3.msra.mxu1 %v2534_v25 }
0x10c9   :  { %4615 = vmatmul.mubr.msk.f32.vlgmr.msra.gmra.mxu1 %vm419_vm2, %v2532_v31  ;;  %4622 = vmatprep.subr.mxu1 %v4877_v14 }
0x10ca   :  { %4623 = vmatpush3.msra.mxu1 %v2699_v22  ;;  %4624 = vmatprep.mubr.msk.f32.mxu1 %vm4878_vm1, %v4877_v14 }
0x10cb   :  { %4632 = vmatprep.subr.mxu1 %v4877_v14 }
0x10cd   :  { %v4817_v28 = vpop.eup %4816 }
0x10ce   :  { %v2697_v54 = vmul.f32 %v4817_v28, %v4809_v57 }
0x10d0   :  { %4625 = vmatmul.mubr.msk.f32.vlgmr.msra.gmra.mxu1 %vm419_vm2, %v2697_v54 }
0x10d1   :  { %v4819_v36 = vpop.eup %4818  ;;  %4633 = vmatpush3.msra.mxu1 %v2864_v55  ;;  %4634 = vmatprep.mubr.msk.f32.mxu1 %vm4878_vm1, %v4877_v14 }
0x10d2   :  { %v2862_v19 = vmul.f32 %v4819_v36, %v4811_v59  ;;  %4642 = vmatprep.subr.mxu1 %v4877_v14 }
0x10d4   :  { %4635 = vmatmul.mubr.msk.f32.vlgmr.msra.gmra.mxu1 %vm419_vm2, %v2862_v19 }
0x10d5   :  { %4644 = vmatprep.mubr.msk.f32.mxu1 %vm4878_vm1, %v4877_v14 }
0x10f8   :  { %v3025_v58 = vpop.xlane.xlu1 %3024 }
0x10f9   :  { %4820 = vrcp.f32 %v3025_v58 }
0x10fc   :  { %v3029_v33 = vpop.permute.xlu1 %3028 }
0x10fd   :  { %4643 = vmatpush3.msra.mxu1 %v3029_v33 }
0x10fe   :  { %4658 = vmatprep.subr.mxu1 %v4877_v14 }
0x1106   :  { %v4821_v38 = vpop.eup %4820 }
0x1107   :  { %v3027_v40 = vmul.f32 %v4821_v38, %v4813_v17 }
0x1109   :  { %4645 = vmatmul.mubr.msk.f32.vlgmr.msra.gmra.mxu1 %vm419_vm2, %v3027_v40 }
0x110a   :  { %4659 = vmatpush3.msra.mxu1 %v5293_v8  ;;  %4674 = vmatprep.mubr.msk.f32.mxu1 %vm4878_vm1, %v4877_v14 }
0x110b   :  { %4660 = vmatprep.subr.mxu1 %v4877_v14 }
0x110c   :  { %4661 = vmatpush3.msra.mxu1 %v5298_v9 }
0x110d   :  { %4662 = vmatprep.subr.mxu1 %v4877_v14 }
0x110e   :  { %4663 = vmatpush3.msra.mxu1 %v5305_v10 }
0x110f   :  { %4664 = vmatprep.subr.mxu1 %v4877_v14 }
0x1110   :  { %4665 = vmatpush3.msra.mxu1 %v5312_v11 }
0x1111   :  { %4666 = vmatprep.subr.mxu1 %v4877_v14 }
0x1112   :  { %4667 = vmatpush3.msra.mxu1 %v5324_v63 }
0x1113   :  { %4668 = vmatprep.subr.mxu1 %v4877_v14 }
0x1114   :  { %4669 = vmatpush3.msra.mxu1 %v5329_v0 }
0x1115   :  { %4670 = vmatprep.subr.mxu1 %v4877_v14 }
0x1116   :  { %4671 = vmatpush3.msra.mxu1 %v5338_v1 }
0x1117   :  { %4672 = vmatprep.subr.mxu1 %v4877_v14 }
0x1118   :  { %4673 = vmatpush3.msra.mxu1 %v5343_v2 }
0x1119   :  { %4692 = vmatprep.subr.mxu1 %v4877_v14 }
0x1189   :  { %v2605_v8 = vpop.f32.mrf.mxu1 }
0x118b   :  { %v4616_v9 = vpop.f32.mrf.mxu1 }
0x1190   :  { %v2770_v10 = vpop.f32.mrf.mxu1 }
0x1191   :  { %3105 = vrot.lane.b32.xlu0 %v2770_v10, %s4886_s30 }
0x1192   :  { %v4626_v11 = vpop.f32.mrf.mxu1 }
0x1194   :  { %v2935_v63 = vpop.f32.mrf.mxu1 }
0x1195   :  { %3109 = vrot.lane.b32.xlu1 %v2935_v63, %s4887_s8 }
0x1196   :  { %v4636_v0 = vpop.f32.mrf.mxu1 }
0x1199   :  { %3284 = vrot.lane.b32.xlu1 %v5576_v24, %s4888_s9 }
0x11c9   :  { %v3100_v1 = vpop.f32.mrf.mxu1 }
0x11ca   :  { %3113 = vrot.lane.b32.xlu0 %v3100_v1, %s4889_s10 }
0x11cb   :  { %v4646_v57 = vpop.f32.mrf.mxu1 }
0x11ce   :  { %3282 = vrot.lane.b32.xlu0 %v5576_v24, %s4880_s16 }
0x1203   :  { %v3106_v2 = vpop.permute.xlu0 %3105 }
0x1204   :  { %v3116_v59 = vsel %vm419_vm2, %v2605_v8, %v3106_v2 }
0x1207   :  { %v3110_v44 = vpop.permute.xlu1 %3109 }
0x1208   :  { %v3117_v42 = vsel %vm1091_vm3, %v3116_v59, %v3110_v44 }
0x120b   :  { %v3285_v45 = vpop.permute.xlu1 %3284 }
0x123c   :  { %v3114_v15 = vpop.permute.xlu0 %3113 }
0x123d   :  { %v3118_v16 = vsel %vm1093_vm4, %v3117_v42, %v3114_v15 }
0x123e   :  { %4656 = vmatmul.mubr.msk.f32.vlgmr.msra.gmra.mxu0 %vm77_vm0, %v3118_v16 }
0x123f   :  { %4678 = vmatpush3.xpose.msk.msra.mxu0 %vm419_vm2, %v3285_v45  ;;  %4679 = vmatprep.mubr.msk.f32.mxu0 %vm4878_vm1, %v4877_v14 }
0x1240   :  { %v3283_v17 = vpop.permute.xlu0 %3282  ;;  %4682 = vmatprep.subr.mxu0 %v4877_v14 }
0x1242   :  { %4680 = vmatmul.mubr.msk.f32.vlgmr.msra.gmra.mxu0 %vm419_vm2, %v3283_v17 }
0x1243   :  { %4684 = vmatprep.mubr.msk.f32.mxu0 %vm4878_vm1, %v4877_v14 }
0x12fe   :  { %v5677_v18 = vpop.f32.mrf.mxu0 }
0x1300   :  { %v4657_v46 = vpop.f32.mrf.mxu0 }
0x1302   :  { %v3356_v49 = vpop.f32.mrf.mxu0 }
0x1303   :  { %v3360_v23 = vsel %vm419_vm2, %v3356_v49, -inf }
0x1304   :  { %3361 = vmax.xlane.f32.xlu1 %v3360_v23  ;;  %v4681_v20 = vpop.f32.mrf.mxu0 }
0x1315   :  { %3449 = vrot.lane.b32.xlu1 %v5576_v24, %s4890_s11 }
0x1319   :  { %3447 = vrot.lane.b32.xlu1 %v5576_v24, %s4883_s19 }
0x131d   :  { %3612 = vrot.lane.b32.xlu1 %v5576_v24, %s4885_s21 }
0x1321   :  { %3777 = vrot.lane.b32.xlu1 %v5576_v24, %s4884_s20 }
0x138d   :  { %v3362_v25 = vpop.xlane.xlu1 %3361 }
0x138e   :  { %v3363_v31 = vsub.f32 %v3356_v49, %v3362_v25 }
0x1390   :  { %v3364_v22 = vmul.f32 1.442695, %v3363_v31 }
0x1391   :  { %v3450_v19 = vpop.permute.xlu1 %3449 }
0x1392   :  { %4822 = vpow2.f32 %v3364_v22 }
0x1395   :  { %v3448_v38 = vpop.permute.xlu1 %3447 }
0x1399   :  { %v3613_v8 = vpop.permute.xlu1 %3612 }
0x139d   :  { %v3778_v10 = vpop.permute.xlu1 %3777 }
0x139f   :  { %v4823_v28 = vpop.eup %4822 }
0x13a0   :  { %v3366_v54 = vsel %vm419_vm2, %v4823_v28, 0.0 }
0x13a1   :  { %3367 = vadd.xlane.f32.xlu0 %v3366_v54 }
0x13b7   :  { %3371 = vrot.lane.b32.xlu0 %v5576_v24, %s4891_s3 }
0x13bb   :  { %3614 = vrot.lane.b32.xlu0 %v5576_v24, %s4892_s12 }
0x13bf   :  { %3779 = vrot.lane.b32.xlu0 %v5576_v24, %s4893_s13 }
0x142a   :  { %v3368_v55 = vpop.xlane.xlu0 %3367 }
0x142b   :  { %4824 = vrcp.f32 %v3368_v55 }
0x142e   :  { %v3372_v36 = vpop.permute.xlu0 %3371 }
0x142f   :  { %4683 = vmatpush3.msra.mxu0 %v3372_v36 }
0x1430   :  { %4687 = vmatprep.subr.mxu0 %v4877_v14 }
0x1432   :  { %v3615_v40 = vpop.permute.xlu0 %3614 }
0x1436   :  { %v3780_v9 = vpop.permute.xlu0 %3779 }
0x1438   :  { %v4825_v58 = vpop.eup %4824 }
0x1439   :  { %v3370_v33 = vmul.f32 %v4825_v58, %v4823_v28 }
0x143b   :  { %4685 = vmatmul.mubr.msk.f32.vlgmr.msra.gmra.mxu0 %vm419_vm2, %v3370_v33 }
0x143c   :  { %4688 = vmatpush3.xpose.msk.msra.mxu0 %vm419_vm2, %v3450_v19  ;;  %4689 = vmatprep.mubr.msk.f32.mxu0 %vm4878_vm1, %v4877_v14  ;;  %v2444_v19 = vmul.f32 %v5553_v47, %v5356_v4 }
0x143d   :  { %4697 = vmatprep.subr.mxu0 %v4877_v14 }
0x143f   :  { %4690 = vmatmul.mubr.msk.f32.vlgmr.msra.gmra.mxu0 %vm419_vm2, %v3448_v38  ;;  %v5740_v38 = vadd.f32 %v2444_v19, %v5361_v6 }
0x1440   :  { %4698 = vmatpush3.xpose.msk.msra.mxu0 %vm419_vm2, %v3615_v40  ;;  %4699 = vmatprep.mubr.msk.f32.mxu0 %vm4878_vm1, %v4877_v14 }
0x1441   :  { %4707 = vmatprep.subr.mxu0 %v4877_v14 }
0x1443   :  { %4700 = vmatmul.mubr.msk.f32.vlgmr.msra.gmra.mxu0 %vm419_vm2, %v3613_v8 }
0x1444   :  { %4708 = vmatpush3.xpose.msk.msra.mxu0 %vm419_vm2, %v3780_v9  ;;  %4709 = vmatprep.mubr.msk.f32.mxu0 %vm4878_vm1, %v4877_v14 }
0x1445   :  { %4717 = vmatprep.subr.mxu0 %v4877_v14 }
0x1447   :  { %4710 = vmatmul.mubr.msk.f32.vlgmr.msra.gmra.mxu0 %vm419_vm2, %v3778_v10 }
0x1448   :  { %4718 = vmatpush3.msra.mxu0 %v5388_v43  ;;  %4725 = vmatprep.mubr.msk.f32.mxu0 %vm4878_vm1, %v4877_v14 }
0x1449   :  { %4719 = vmatprep.subr.mxu0 %v4877_v14 }
0x144a   :  { %4720 = vmatpush3.msra.mxu0 %v5395_v51 }
0x144b   :  { %4721 = vmatprep.subr.mxu0 %v4877_v14 }
0x144c   :  { %4722 = vmatpush3.msra.mxu0 %v5400_v53 }
0x144d   :  { %4723 = vmatprep.subr.mxu0 %v4877_v14 }
0x144e   :  { %4724 = vmatpush3.msra.mxu0 %v5411_v62 }
0x14fb   :  { %v5721_v11 = vpop.f32.mrf.mxu0 }
0x14fd   :  { %v4686_v63 = vpop.f32.mrf.mxu0 }
0x14ff   :  { %v3521_v0 = vpop.f32.mrf.mxu0 }
0x1500   :  { %v3525_v43 = vsel %vm419_vm2, %v3521_v0, -inf }
0x1501   :  { %3526 = vmax.xlane.f32.xlu0 %v3525_v43  ;;  %v4691_v1 = vpop.f32.mrf.mxu0 }
0x1503   :  { %v3686_v57 = vpop.f32.mrf.mxu0 }
0x1504   :  { %v3690_v2 = vsel %vm419_vm2, %v3686_v57, -inf }
0x1505   :  { %3691 = vmax.xlane.f32.xlu1 %v3690_v2  ;;  %v4701_v51 = vpop.f32.mrf.mxu0 }
0x1507   :  { %v3851_v44 = vpop.f32.mrf.mxu0 }
0x1508   :  { %v3855_v53 = vsel %vm419_vm2, %v3851_v44, -inf }
0x1509   :  { %3856 = vmax.xlane.f32.xlu0 %v3855_v53  ;;  %v4711_v59 = vpop.f32.mrf.mxu0 }
0x1516   :  { %3536 = vrot.lane.b32.xlu1 %v5576_v24, %s4889_s10 }
0x151a   :  { %3701 = vrot.lane.b32.xlu1 %v5576_v24, %s4887_s8 }
0x158a   :  { %v3527_v62 = vpop.xlane.xlu0 %3526 }
0x158b   :  { %v3528_v42 = vsub.f32 %v3521_v0, %v3527_v62 }
0x158d   :  { %v3529_v15 = vmul.f32 1.442695, %v3528_v42 }
0x158e   :  { %v3692_v16 = vpop.xlane.xlu1 %3691 }
0x158f   :  { %4826 = vpow2.f32 %v3529_v15  ;;  %v3693_v45 = vsub.f32 %v3686_v57, %v3692_v16 }
0x1591   :  { %v3694_v17 = vmul.f32 1.442695, %v3693_v45 }
0x1592   :  { %v3857_v46 = vpop.xlane.xlu0 %3856  ;;  %v3537_v55 = vpop.permute.xlu1 %3536 }
0x1593   :  { %4828 = vpow2.f32 %v3694_v17  ;;  %v3858_v49 = vsub.f32 %v3851_v44, %v3857_v46 }
0x1595   :  { %v3859_v23 = vmul.f32 1.442695, %v3858_v49 }
0x1596   :  { %v3702_v58 = vpop.permute.xlu1 %3701 }
0x1597   :  { %4830 = vpow2.f32 %v3859_v23 }
0x159c   :  { %v4827_v20 = vpop.eup %4826 }
0x159d   :  { %v3531_v25 = vsel %vm419_vm2, %v4827_v20, 0.0 }
0x159e   :  { %3532 = vadd.xlane.f32.xlu0 %v3531_v25  ;;  %v3280_v25 = vmul.f32 %v5553_v47, %v5086_v35 }
0x15a0   :  { %v4829_v31 = vpop.eup %4828 }
0x15a1   :  { %v3696_v22 = vsel %vm419_vm2, %v4829_v31, 0.0 }
0x15a2   :  { %3697 = vadd.xlane.f32.xlu0 %v3696_v22 }
0x15a4   :  { %v4831_v28 = vpop.eup %4830 }
0x15a5   :  { %v3861_v54 = vsel %vm419_vm2, %v4831_v28, 0.0 }
0x15a6   :  { %3862 = vadd.xlane.f32.xlu1 %v3861_v54 }
0x15b7   :  { %3866 = vrot.lane.b32.xlu1 %v5576_v24, %s4886_s30 }
0x15b8   :  { %3193 = vrot.lane.b32.xlu0 %v5677_v18, %s4891_s3 }
0x1627   :  { %v3533_v36 = vpop.xlane.xlu0 %3532 }
0x1628   :  { %4832 = vrcp.f32 %v3533_v36 }
0x162b   :  { %v3698_v33 = vpop.xlane.xlu0 %3697 }
0x162c   :  { %4834 = vrcp.f32 %v3698_v33 }
0x162f   :  { %v3863_v40 = vpop.xlane.xlu1 %3862  ;;  %v3194_v8 = vpop.permute.xlu0 %3193 }
0x1630   :  { %4836 = vrcp.f32 %v3863_v40  ;;  %v3196_v24 = vsel %vm77_vm0, %v5740_v38, %v3194_v8 }
0x1631   :  { %4675 = vmatmul.mubr.msk.f32.vlgmr.msra.gmra.mxu1 %vm1176_vm5, %v3196_v24 }
0x1632   :  { %4693 = vmatpush3.msra.mxu1 %v3537_v55  ;;  %4694 = vmatprep.mubr.msk.f32.mxu1 %vm4878_vm1, %v4877_v14 }
0x1633   :  { %4702 = vmatprep.subr.mxu1 %v4877_v14  ;;  %v3867_v63 = vpop.permute.xlu1 %3866 }
0x1635   :  { %v4833_v4 = vpop.eup %4832 }
0x1636   :  { %v3535_v9 = vmul.f32 %v4833_v4, %v4827_v20 }
0x1638   :  { %4695 = vmatmul.mubr.msk.f32.vlgmr.msra.gmra.mxu1 %vm419_vm2, %v3535_v9 }
0x1639   :  { %v4835_v6 = vpop.eup %4834  ;;  %4703 = vmatpush3.msra.mxu1 %v3702_v58  ;;  %4704 = vmatprep.mubr.msk.f32.mxu1 %vm4878_vm1, %v4877_v14 }
0x163a   :  { %4712 = vmatprep.subr.mxu1 %v4877_v14  ;;  %v3700_v10 = vmul.f32 %v4835_v6, %v4829_v31  ;;  %v3281_v31 = vadd.f32 %v3280_v25, %v5092_v37 }
0x163c   :  { %4705 = vmatmul.mubr.msk.f32.vlgmr.msra.gmra.mxu1 %vm419_vm2, %v3700_v10 }
0x163d   :  { %v4837_v0 = vpop.eup %4836  ;;  %4713 = vmatpush3.msra.mxu1 %v3867_v63  ;;  %4714 = vmatprep.mubr.msk.f32.mxu1 %vm4878_vm1, %v4877_v14 }
0x163e   :  { %v3865_v43 = vmul.f32 %v4837_v0, %v4831_v28  ;;  %4728 = vmatprep.subr.mxu1 %v4877_v14 }
0x1640   :  { %4715 = vmatmul.mubr.msk.f32.vlgmr.msra.gmra.mxu1 %vm419_vm2, %v3865_v43 }
0x1641   :  { %4729 = vmatpush3.msra.mxu1 %v5472_v26  ;;  %4744 = vmatprep.mubr.msk.f32.mxu1 %vm4878_vm1, %v4877_v14 }
0x1642   :  { %4730 = vmatprep.subr.mxu1 %v4877_v14 }
0x1643   :  { %4731 = vmatpush3.msra.mxu1 %v5477_v29 }
0x1644   :  { %4732 = vmatprep.subr.mxu1 %v4877_v14 }
0x1645   :  { %4733 = vmatpush3.msra.mxu1 %v5484_v60 }
0x1646   :  { %4734 = vmatprep.subr.mxu1 %v4877_v14 }
0x1647   :  { %4735 = vmatpush3.msra.mxu1 %v5491_v3 }
0x1648   :  { %4736 = vmatprep.subr.mxu1 %v4877_v14 }
0x1649   :  { %4737 = vmatpush3.msra.mxu1 %v5498_v5 }
0x164a   :  { %4738 = vmatprep.subr.mxu1 %v4877_v14 }
0x164b   :  { %4739 = vmatpush3.msra.mxu1 %v5505_v7 }
0x164c   :  { %4740 = vmatprep.subr.mxu1 %v4877_v14 }
0x164d   :  { %4741 = vmatpush3.msra.mxu1 %v5512_v61 }
0x164e   :  { %4742 = vmatprep.subr.mxu1 %v4877_v14  ;;  %v4854_v14 = vld [vmem:[%s5840_s5] sm:$0x7]  ;;  %s4894_s5 = smov [#allocation2]  }
0x164f   :  { %4743 = vmatpush3.msra.mxu1 %v5519_v12  ;;  %v5782_v61 = vrot.slane %v4854_v14, %v75_v32  ;;  %s4140_s17 = sshll.u32 %s4894_s5, 4  ;;  %s4141_s17 = int_to_ptr.vmem [resolvable:$true] %s4140_s17 }
0x1650   :  { %s4855_s18 = scalar_lea.vmem %s4141_s17, 256  ;;  %p4860_p1 = scmp.lt.s32.totalorder %s4141_s17, %s4141_s17 }
0x1651   :  { %p4856_p0 = scmp.ne.s32.totalorder %s4141_s17, %s4855_s18  ;;  %p4861_p2 = scmp.lt.s32.totalorder %s4855_s18, %s4855_s18 }
0x1653   :  { %p4862_p3 = por %p4861_p2, %p4860_p1 }
0x1655   :  { %p4863_p4 = pnand %p4862_p3, %p4856_p0 }
0x16f1   :  { %v3266_v26 = vpop.f32.mrf.mxu1 }
0x16f3   :  { %v4676_v29 = vpop.f32.mrf.mxu1 }
0x16f8   :  { %v3608_v60 = vpop.f32.mrf.mxu1 }
0x16f9   :  { %3943 = vrot.lane.b32.xlu0 %v3608_v60, %s4886_s30 }
0x16fa   :  { %v4696_v3 = vpop.f32.mrf.mxu1 }
0x16fc   :  { %v3773_v1 = vpop.f32.mrf.mxu1 }
0x16fd   :  { %3947 = vrot.lane.b32.xlu1 %v3773_v1, %s4887_s8 }
0x16fe   :  { %v4706_v5 = vpop.f32.mrf.mxu1 }
0x1700   :  { %v3938_v57 = vpop.f32.mrf.mxu1 }
0x1701   :  { %3951 = vrot.lane.b32.xlu0 %v3938_v57, %s4889_s10 }
0x1702   :  { %v4716_v7 = vpop.f32.mrf.mxu1 }
0x1705   :  { %152 = vrot.lane.b32.xlu0 %v5782_v61, %s4880_s16 }
0x1709   :  { %2023 = vrot.lane.b32.xlu0 %v5782_v61, %s4891_s3 }
0x176b   :  { %v3944_v12 = vpop.permute.xlu0 %3943 }
0x176c   :  { %v3954_v51 = vsel %vm419_vm2, %v5721_v11, %v3944_v12 }
0x176f   :  { %v3948_v2 = vpop.permute.xlu1 %3947 }
0x1770   :  { %v3955_v44 = vsel %vm1091_vm3, %v3954_v51, %v3948_v2  ;;  %v2196_v2 = vadd.f32 %v5529_v52, %v5782_v61 }
0x1773   :  { %v3952_v53 = vpop.permute.xlu0 %3951 }
0x1774   :  { %v3956_v59 = vsel %vm1093_vm4, %v3955_v44, %v3952_v53 }
0x1775   :  { %4726 = vmatmul.mubr.msk.f32.vlgmr.msra.gmra.mxu0 %vm77_vm0, %v3956_v59 }
0x1777   :  { %v153_v30 = vpop.permute.xlu0 %152 }
0x1778   :  { %v225_v49 = vadd.f32 %v5106_v48, %v153_v30  ;;  %v2269_v10 = vadd.f32 %v5531_v41, %v153_v30 }
0x177b   :  { %v2024_v32 = vpop.permute.xlu0 %2023 }
0x177c   :  { %v2096_v62 = vadd.f32 %v5573_v34, %v2024_v32 }
0x177e   :  { %v4184_v42 = vmul.f32 -1.442695, %v2096_v62 }
0x1780   :  { %4838 = vpow2.f32 %v4184_v42 }
0x178d   :  { %v4839_v15 = vpop.eup %4838 }
0x178e   :  { %v2102_v16 = vadd.f32 1.0, %v4839_v15 }
0x1790   :  { %4840 = vrcp.f32 %v2102_v16 }
0x179d   :  { %v4841_v45 = vpop.eup %4840 }
0x179e   :  { %v2106_v46 = vsub.f32 1.0, %v4841_v45  ;;  %v2105_v23 = vmul.f32 %v4841_v45, %v5539_v21 }
0x17a0   :  { %v2107_v34 = vmul.f32 %v2106_v46, %v5525_v27 }
0x17a2   :  { %v2108_v20 = vadd.f32 %v2107_v34, %v2105_v23 }
0x1835   :  { %v5794_v17 = vpop.f32.mrf.mxu0 }
0x1836   :  { %4031 = vrot.lane.b32.xlu1 %v5794_v17, %s4891_s3 }
0x1837   :  { %v4727_v11 = vpop.f32.mrf.mxu0 }
0x183a   :  { %1173 = vrot.lane.b32.xlu1 %v5782_v61, %s4888_s9 }
0x183e   :  { %2110 = vrot.lane.b32.xlu1 %v225_v49, %s4891_s3 }
0x1842   :  { %2118 = vrot.lane.b32.xlu1 %v2108_v20, %s4880_s16 }
0x18a8   :  { %v4032_v22 = vpop.permute.xlu1 %4031 }
0x18a9   :  { %v4034_v28 = vsel %vm77_vm0, %v3281_v31, %v4032_v22 }
0x18aa   :  { %4745 = vmatmul.mubr.msk.f32.vlgmr.msra.gmra.mxu1 %vm1176_vm5, %v4034_v28 }
0x18ac   :  { %v1174_v48 = vpop.permute.xlu1 %1173 }
0x18ad   :  { %v1247_v27 = vadd.f32 %v5402_v56, %v1174_v48  ;;  %v3267_v54 = vadd.f32 %v3266_v26, %v1174_v48 }
0x18af   :  { %v4169_v55 = vmul.f32 -1.442695, %v1247_v27  ;;  %v4203_v36 = vmul.f32 -1.442695, %v3267_v54 }
0x18b0   :  { %v2111_v63 = vpop.permute.xlu1 %2110 }
0x18b1   :  { %4842 = vpow2.f32 %v4169_v55 }
0x18b2   :  { %4844 = vpow2.f32 %v4203_v36 }
0x18b4   :  { %v2119_v0 = vpop.permute.xlu1 %2118 }
0x18be   :  { %v4843_v21 = vpop.eup %4842 }
0x18bf   :  { %v4845_v19 = vpop.eup %4844  ;;  %v1253_v58 = vadd.f32 1.0, %v4843_v21 }
0x18c0   :  { %v3273_v33 = vadd.f32 1.0, %v4845_v19 }
0x18c1   :  { %4846 = vrcp.f32 %v1253_v58 }
0x18c2   :  { %4848 = vrcp.f32 %v3273_v33 }
0x18ce   :  { %v4847_v35 = vpop.eup %4846 }
0x18cf   :  { %v4849_v37 = vpop.eup %4848  ;;  %v1257_v47 = vsub.f32 1.0, %v4847_v35  ;;  %v1256_v8 = vmul.f32 %v4847_v35, %v5366_v13  ;;  %v148_v13 = vadd.f32 %v5108_v50, %v5782_v61 }
0x18d0   :  { %v3277_v40 = vsub.f32 1.0, %v4849_v37  ;;  %v3276_v56 = vmul.f32 %v4849_v37, %v5740_v38 }
0x18d1   :  { %v1258_v24 = vmul.f32 %v1257_v47, %v5244_v39  ;;  %v2121_v39 = vsel %vm77_vm0, %v148_v13, %v2111_v63 }
0x18d2   :  { %v3278_v4 = vmul.f32 %v3277_v40, %v5677_v18 }
0x18d3   :  { %v1259_v9 = vadd.f32 %v1258_v24, %v1256_v8 }
0x18d4   :  { %v3279_v6 = vadd.f32 %v3278_v4, %v3276_v56 }
0x18d5   :  { %2114 = vrot.lane.b32.xlu0 %v1259_v9, %s4888_s9 }
0x18d6   :  { %4123 = vrot.lane.b32.xlu1 %v3279_v6, %s4888_s9 }
0x18d9   :  { %4119 = vrot.lane.b32.xlu0 %v2269_v10, %s4891_s3 }
0x1947   :  { %v2115_v38 = vpop.permute.xlu0 %2114 }
0x1948   :  { %v2122_v18 = vsel %vm1176_vm5, %v2121_v39, %v2115_v38  ;;  %v4124_v44 = vpop.permute.xlu1 %4123 }
0x1949   :  { %v2124_v43 = vsel %vm2123_vm6, %v2122_v18, %v2119_v0 }
0x194a   :  { %2125 = vst [vmem:[#allocation2] sm:$0xff] %v2124_v43 }
0x194b   :  { %v4120_v12 = vpop.permute.xlu0 %4119 }
0x194c   :  { %v4130_v51 = vsel %vm77_vm0, %v2196_v2, %v4120_v12 }
0x194d   :  { %v4131_v59 = vsel %vm1176_vm5, %v4130_v51, %v4124_v44 }
0x196a   :  { %v4104_v26 = vpop.f32.mrf.mxu1 }
0x196b   :  { %v4105_v29 = vadd.f32 %v4104_v26, %v2024_v32 }
0x196c   :  { %v4746_v60 = vpop.f32.mrf.mxu1 }
0x196d   :  { %v4218_v41 = vmul.f32 -1.442695, %v4105_v29 }
0x196f   :  { %4850 = vpow2.f32 %v4218_v41 }
0x197c   :  { %v4851_v3 = vpop.eup %4850 }
0x197d   :  { %v4111_v1 = vadd.f32 1.0, %v4851_v3 }
0x197f   :  { %4852 = vrcp.f32 %v4111_v1 }
0x198c   :  { %v4853_v5 = vpop.eup %4852 }
0x198d   :  { %v4115_v50 = vsub.f32 1.0, %v4853_v5  ;;  %v4114_v57 = vmul.f32 %v4853_v5, %v3281_v31 }
0x198f   :  { %v4116_v7 = vmul.f32 %v4115_v50, %v5794_v17 }
0x1991   :  { %v4117_v14 = vadd.f32 %v4116_v7, %v4114_v57 }
0x1993   :  { %4127 = vrot.lane.b32.xlu0 %v4117_v14, %s4880_s16 }
0x1a05   :  { %v4128_v53 = vpop.permute.xlu0 %4127 }
0x1a06   :  { %v4132_v30 = vsel %vm2123_vm6, %v4131_v59, %v4128_v53 }
0x1a07   :  { %4134 = vst [vmem:[#allocation2 + $0x8] sm:$0xff] %v4132_v30 }
0x1a08   :  { %4866 = shalt.err (!%p4863_p4)
}
0x1a09   :  { %s4895_s16 = smov 128  }
0x1a0a   :  { %4146 = dma.vmem_to_hbm [thread:$0]  %s4141_s17, 256, %s5842_s7, [#allocation3], %s4895_s16, %s4895_s16, %s4886_s30  }
0x1a0b   :  { %4875 = dma.done.wait [#allocation3], 256  }
0x1a0c   :  { %4876 = vsyncadd [#allocation3], 4294967040 }
0x1a0d   :  { %4150 = vsyncpa [#allocation3], 1 }

</bundles_post_ra>
